<compile_context>
chip_gen: v5e
topology: v5e:2x2
jax: 0.10.0
libtpu: 0.0.40
codegen_flags: <defaults>
</compile_context>

<pallas_src>
import functools

import jax
import jax.numpy as jnp
from jax import lax
from jax.experimental import pallas as pl
from jax.experimental.pallas import tpu as pltpu


def eval_kernel(gx1_ref,                     # (T, Bp, 4H)  precomputed x@Wih1 + b1
                whh1_ref,                    # (H, 4H)      level-1 recurrent weights
                wih2_ref, whh2_ref, b2_ref,  # (H, 4H), (H, 4H), (1, 4H)  level-2 LSTM
                wenc_ref, benc_ref,          # (H, F), (1, F)   Linear(H -> fc_dim)
                wfc_ref, bfc_ref,            # (1, F), (1, 1)   Linear(fc_dim -> 1)
                out_ref,                     # (Bp, 1)
                *, T, Bp, H):
    whh1 = whh1_ref[...]
    wih2 = wih2_ref[...]
    whh2 = whh2_ref[...]
    b2 = b2_ref[...]

    def gate_update(gates, c):
        # Whole-vreg activations (EUP) + static lane slices, PyTorch gate order i,f,g,o.
        sig = jax.nn.sigmoid(gates)
        th = jnp.tanh(gates)
        i = sig[:, 0 * H:1 * H]
        f = sig[:, 1 * H:2 * H]
        g = th[:, 2 * H:3 * H]
        o = sig[:, 3 * H:4 * H]
        c_new = f * c + i * g
        h_new = o * jnp.tanh(c_new)
        return h_new, c_new

    zeros = jnp.zeros((Bp, H), jnp.float32)

    def step(t, carry):
        h1, c1, h2, c2 = carry
        # Level 1: input-side gate pre-activations were batched outside the loop;
        # only the recurrent matmul is on the serial chain.
        gates1 = gx1_ref[t] + jnp.dot(h1, whh1, preferred_element_type=jnp.float32)
        h1, c1 = gate_update(gates1, c1)
        # Level 2: the h2-side matmul depends only on last step's h2, so after the
        # full unroll it overlaps with the level-1 work above.
        gates2 = (jnp.dot(h1, wih2, preferred_element_type=jnp.float32)
                  + jnp.dot(h2, whh2, preferred_element_type=jnp.float32)
                  + b2)
        h2, c2 = gate_update(gates2, c2)
        return h1, c1, h2, c2

    _, _, h2, _ = lax.fori_loop(0, T, step, (zeros, zeros, zeros, zeros), unroll=True)

    # encoded = Linear(H -> fc_dim)
    enc = jnp.dot(h2, wenc_ref[...], preferred_element_type=jnp.float32) + benc_ref[...]
    # evaluation = sigmoid(Linear(fc_dim -> 1)) as a lane reduction (no N=1 MXU matmul).
    logit = jnp.sum(enc * wfc_ref[...], axis=-1, keepdims=True) + bfc_ref[...]
    out_ref[...] = jax.nn.sigmoid(logit)


def init_params(key, word_count, embedding_dim, lstm_hidden_size, fc_dim):
    H, E, F = lstm_hidden_size, embedding_dim, fc_dim
    ks = jax.random.split(key, 12)
    s = 1.0 / jnp.sqrt(jnp.float32(H))
    sf = 1.0 / jnp.sqrt(jnp.float32(F))
    u = lambda k, shape, scale: jax.random.uniform(k, shape, jnp.float32, -scale, scale)
    return {
        "embedding": jax.random.normal(ks[0], (word_count, E), jnp.float32),
        # input-major (in_dim, out_dim) so every matmul is act @ W
        "wih1": u(ks[1], (E, 4 * H), s),
        "whh1": u(ks[2], (H, 4 * H), s),
        "b1":   u(ks[3], (1, 4 * H), s),
        "wih2": u(ks[4], (H, 4 * H), s),
        "whh2": u(ks[5], (H, 4 * H), s),
        "b2":   u(ks[6], (1, 4 * H), s),
        "wenc": u(ks[7], (H, F), s),
        "benc": u(ks[8], (1, F), s),
        "wfc":  u(ks[9], (1, F), sf),   # stored as a row for the lane reduction
        "bfc":  u(ks[10], (1, 1), sf),
    }


def evaluation_forward(P, params):
    B, T = P.shape
    H = params["whh1"].shape[0]

    # Embedding gather directly in time-major order (avoids a separate (B,T,E)->(T,B,E)
    # transpose of the embedded sequence).
    x = jnp.take(params["embedding"], P.T, axis=0).astype(jnp.float32)   # (T, B, E)

    # Pad batch up to the sublane height so every vreg row is used.
    Bp = -(-B // 8) * 8
    if Bp != B:
        x = jnp.pad(x, ((0, 0), (0, Bp - B), (0, 0)))

    # Batched level-1 input projection over ALL timesteps (one matmul, bias folded in).
    gx1 = jnp.einsum("tbe,eg->tbg", x, params["wih1"],
                     preferred_element_type=jnp.float32) + params["b1"]  # (T, Bp, 4H)

    kernel = functools.partial(eval_kernel, T=T, Bp=Bp, H=H)
    out = pl.pallas_call(
        kernel,
        out_shape=jax.ShapeDtypeStruct((Bp, 1), jnp.float32),
        in_specs=[pl.BlockSpec(memory_space=pltpu.MemorySpace.VMEM)] * 9,
        out_specs=pl.BlockSpec(memory_space=pltpu.MemorySpace.VMEM),
    )(gx1,
      params["whh1"],
      params["wih2"], params["whh2"], params["b2"],
      params["wenc"], params["benc"],
      params["wfc"], params["bfc"])
    return out[:B]


def _reference_forward(P, params):
    # Pure-JAX reference with identical semantics (for a correctness check).
    H = params["whh1"].shape[0]
    emb = jnp.take(params["embedding"], P, axis=0).astype(jnp.float32)   # (B, T, E)
    x = jnp.transpose(emb, (1, 0, 2))                                    # (T, B, E)
    B = x.shape[1]

    def run_lstm(seq, wih, whh, b):
        def step(carry, x_t):
            h, c = carry
            g = x_t @ wih + h @ whh + b
            i = jax.nn.sigmoid(g[:, 0 * H:1 * H])
            f = jax.nn.sigmoid(g[:, 1 * H:2 * H])
            gg = jnp.tanh(g[:, 2 * H:3 * H])
            o = jax.nn.sigmoid(g[:, 3 * H:4 * H])
            c = f * c + i * gg
            h = o * jnp.tanh(c)
            return (h, c), h

        init = (jnp.zeros((B, H), jnp.float32), jnp.zeros((B, H), jnp.float32))
        (h_last, _), hs = lax.scan(step, init, seq)
        return hs, h_last

    hs1, _ = run_lstm(x, params["wih1"], params["whh1"], params["b1"])
    _, h2 = run_lstm(hs1, params["wih2"], params["whh2"], params["b2"])
    enc = h2 @ params["wenc"] + params["benc"]
    logit = jnp.sum(enc * params["wfc"], axis=-1, keepdims=True) + params["bfc"]
    return jax.nn.sigmoid(logit)


if __name__ == "__main__":
    # Small shapes consistent with the module's forward.
    word_count = 100
    sequence_length = 8     # T
    lstm_hidden_size = 32   # H  -> 4H = 128 = one full lane width
    embedding_dim = 32      # E
    lstm_num_layers = 1     # TODO(synk): only 1 layer per LSTM level implemented.
    fc_dim = 32
    batch = 2

    key = jax.random.PRNGKey(0)
    k_params, k_tokens = jax.random.split(key)
    params = init_params(k_params, word_count, embedding_dim, lstm_hidden_size, fc_dim)

    P = jax.random.randint(k_tokens, (batch, sequence_length), 0, word_count, dtype=jnp.int32)

    evaluation = evaluation_forward(P, params)
    jax.block_until_ready(evaluation)
    assert evaluation.shape == (batch, 1)
    assert bool(jnp.all((evaluation >= 0.0) & (evaluation <= 1.0)))

    ref = _reference_forward(P, params)
    assert bool(jnp.allclose(evaluation, ref, atol=2e-2, rtol=2e-2))

    print("KERNEL_OK")
</pallas_src>

<mosaic_0001>
module attributes {stable_mosaic.version = 11 : i64} {
  func.func @eval_kernel(%arg0: memref<8x8x128xf32, #tpu.memory_space<vmem>>, %arg1: memref<32x128xf32, #tpu.memory_space<vmem>>, %arg2: memref<32x128xf32, #tpu.memory_space<vmem>>, %arg3: memref<32x128xf32, #tpu.memory_space<vmem>>, %arg4: memref<1x128xf32, #tpu.memory_space<vmem>>, %arg5: memref<32x32xf32, #tpu.memory_space<vmem>>, %arg6: memref<1x32xf32, #tpu.memory_space<vmem>>, %arg7: memref<1x32xf32, #tpu.memory_space<vmem>>, %arg8: memref<1x1xf32, #tpu.memory_space<vmem>>, %arg9: memref<8x1xf32, #tpu.memory_space<vmem>>) attributes {dimension_semantics = [], scalar_prefetch = 0 : i64, scratch_operands = 0 : i64, tpu.core_type = #tpu.core_type<tc>} {
    %c0 = arith.constant 0 : index
    %c0_0 = arith.constant 0 : index
    %0 = vector.load %arg1[%c0, %c0_0] : memref<32x128xf32, #tpu.memory_space<vmem>>, vector<32x128xf32>
    %c0_1 = arith.constant 0 : index
    %c0_2 = arith.constant 0 : index
    %1 = vector.load %arg2[%c0_1, %c0_2] : memref<32x128xf32, #tpu.memory_space<vmem>>, vector<32x128xf32>
    %c0_3 = arith.constant 0 : index
    %c0_4 = arith.constant 0 : index
    %2 = vector.load %arg3[%c0_3, %c0_4] : memref<32x128xf32, #tpu.memory_space<vmem>>, vector<32x128xf32>
    %c0_5 = arith.constant 0 : index
    %c0_6 = arith.constant 0 : index
    %3 = vector.load %arg4[%c0_5, %c0_6] : memref<1x128xf32, #tpu.memory_space<vmem>>, vector<1x128xf32>
    %cst = arith.constant 0.000000e+00 : f32
    %4 = vector.broadcast %cst : f32 to vector<8x32xf32>
    %c0_i32 = arith.constant 0 : i32
    %5 = arith.index_cast %c0_i32 : i32 to index
    %c0_7 = arith.constant 0 : index
    %c0_8 = arith.constant 0 : index
    %6 = vector.load %arg0[%5, %c0_7, %c0_8] : memref<8x8x128xf32, #tpu.memory_space<vmem>>, vector<1x8x128xf32>
    %7 = vector.shape_cast %6 : vector<1x8x128xf32> to vector<8x128xf32>
    %cst_9 = arith.constant dense<0.000000e+00> : vector<8x128xf32>
    %8 = tpu.matmul %4, %0, %cst_9 {dimension_numbers = #tpu.dot_dimension_numbers<[1], [0], [0], [1], [0, 0, 1, 1], [], []>} : vector<8x32xf32>, vector<32x128xf32>, vector<8x128xf32> -> vector<8x128xf32>
    %9 = arith.addf %7, %8 : vector<8x128xf32>
    %10 = arith.negf %9 : vector<8x128xf32>
    %11 = math.exp %10 : vector<8x128xf32>
    %cst_10 = arith.constant 1.000000e+00 : f32
    %12 = vector.broadcast %cst_10 : f32 to vector<8x128xf32>
    %13 = arith.addf %12, %11 : vector<8x128xf32>
    %14 = arith.divf %12, %13 : vector<8x128xf32>
    %15 = math.tanh %9 : vector<8x128xf32>
    %16 = vector.extract_strided_slice %14 {offsets = [0, 0], sizes = [8, 32], strides = [1, 1]} : vector<8x128xf32> to vector<8x32xf32>
    %17 = vector.extract_strided_slice %14 {offsets = [0, 32], sizes = [8, 32], strides = [1, 1]} : vector<8x128xf32> to vector<8x32xf32>
    %18 = vector.extract_strided_slice %15 {offsets = [0, 64], sizes = [8, 32], strides = [1, 1]} : vector<8x128xf32> to vector<8x32xf32>
    %19 = vector.extract_strided_slice %14 {offsets = [0, 96], sizes = [8, 32], strides = [1, 1]} : vector<8x128xf32> to vector<8x32xf32>
    %20 = arith.mulf %17, %4 : vector<8x32xf32>
    %21 = arith.mulf %16, %18 : vector<8x32xf32>
    %22 = arith.addf %20, %21 : vector<8x32xf32>
    %23 = math.tanh %22 : vector<8x32xf32>
    %24 = arith.mulf %19, %23 : vector<8x32xf32>
    %cst_11 = arith.constant dense<0.000000e+00> : vector<8x128xf32>
    %25 = tpu.matmul %24, %1, %cst_11 {dimension_numbers = #tpu.dot_dimension_numbers<[1], [0], [0], [1], [0, 0, 1, 1], [], []>} : vector<8x32xf32>, vector<32x128xf32>, vector<8x128xf32> -> vector<8x128xf32>
    %cst_12 = arith.constant dense<0.000000e+00> : vector<8x128xf32>
    %26 = tpu.matmul %4, %2, %cst_12 {dimension_numbers = #tpu.dot_dimension_numbers<[1], [0], [0], [1], [0, 0, 1, 1], [], []>} : vector<8x32xf32>, vector<32x128xf32>, vector<8x128xf32> -> vector<8x128xf32>
    %27 = arith.addf %25, %26 : vector<8x128xf32>
    %28 = vector.broadcast %3 : vector<1x128xf32> to vector<8x128xf32>
    %29 = arith.addf %27, %28 : vector<8x128xf32>
    %30 = arith.negf %29 : vector<8x128xf32>
    %31 = math.exp %30 : vector<8x128xf32>
    %cst_13 = arith.constant 1.000000e+00 : f32
    %32 = vector.broadcast %cst_13 : f32 to vector<8x128xf32>
    %33 = arith.addf %32, %31 : vector<8x128xf32>
    %34 = arith.divf %32, %33 : vector<8x128xf32>
    %35 = math.tanh %29 : vector<8x128xf32>
    %36 = vector.extract_strided_slice %34 {offsets = [0, 0], sizes = [8, 32], strides = [1, 1]} : vector<8x128xf32> to vector<8x32xf32>
    %37 = vector.extract_strided_slice %34 {offsets = [0, 32], sizes = [8, 32], strides = [1, 1]} : vector<8x128xf32> to vector<8x32xf32>
    %38 = vector.extract_strided_slice %35 {offsets = [0, 64], sizes = [8, 32], strides = [1, 1]} : vector<8x128xf32> to vector<8x32xf32>
    %39 = vector.extract_strided_slice %34 {offsets = [0, 96], sizes = [8, 32], strides = [1, 1]} : vector<8x128xf32> to vector<8x32xf32>
    %40 = arith.mulf %37, %4 : vector<8x32xf32>
    %41 = arith.mulf %36, %38 : vector<8x32xf32>
    %42 = arith.addf %40, %41 : vector<8x32xf32>
    %43 = math.tanh %42 : vector<8x32xf32>
    %44 = arith.mulf %39, %43 : vector<8x32xf32>
    %c1_i32 = arith.constant 1 : i32
    %45 = arith.index_cast %c1_i32 : i32 to index
    %c0_14 = arith.constant 0 : index
    %c0_15 = arith.constant 0 : index
    %46 = vector.load %arg0[%45, %c0_14, %c0_15] : memref<8x8x128xf32, #tpu.memory_space<vmem>>, vector<1x8x128xf32>
    %47 = vector.shape_cast %46 : vector<1x8x128xf32> to vector<8x128xf32>
    %cst_16 = arith.constant dense<0.000000e+00> : vector<8x128xf32>
    %48 = tpu.matmul %24, %0, %cst_16 {dimension_numbers = #tpu.dot_dimension_numbers<[1], [0], [0], [1], [0, 0, 1, 1], [], []>} : vector<8x32xf32>, vector<32x128xf32>, vector<8x128xf32> -> vector<8x128xf32>
    %49 = arith.addf %47, %48 : vector<8x128xf32>
    %50 = arith.negf %49 : vector<8x128xf32>
    %51 = math.exp %50 : vector<8x128xf32>
    %cst_17 = arith.constant 1.000000e+00 : f32
    %52 = vector.broadcast %cst_17 : f32 to vector<8x128xf32>
    %53 = arith.addf %52, %51 : vector<8x128xf32>
    %54 = arith.divf %52, %53 : vector<8x128xf32>
    %55 = math.tanh %49 : vector<8x128xf32>
    %56 = vector.extract_strided_slice %54 {offsets = [0, 0], sizes = [8, 32], strides = [1, 1]} : vector<8x128xf32> to vector<8x32xf32>
    %57 = vector.extract_strided_slice %54 {offsets = [0, 32], sizes = [8, 32], strides = [1, 1]} : vector<8x128xf32> to vector<8x32xf32>
    %58 = vector.extract_strided_slice %55 {offsets = [0, 64], sizes = [8, 32], strides = [1, 1]} : vector<8x128xf32> to vector<8x32xf32>
    %59 = vector.extract_strided_slice %54 {offsets = [0, 96], sizes = [8, 32], strides = [1, 1]} : vector<8x128xf32> to vector<8x32xf32>
    %60 = arith.mulf %57, %22 : vector<8x32xf32>
    %61 = arith.mulf %56, %58 : vector<8x32xf32>
    %62 = arith.addf %60, %61 : vector<8x32xf32>
    %63 = math.tanh %62 : vector<8x32xf32>
    %64 = arith.mulf %59, %63 : vector<8x32xf32>
    %cst_18 = arith.constant dense<0.000000e+00> : vector<8x128xf32>
    %65 = tpu.matmul %64, %1, %cst_18 {dimension_numbers = #tpu.dot_dimension_numbers<[1], [0], [0], [1], [0, 0, 1, 1], [], []>} : vector<8x32xf32>, vector<32x128xf32>, vector<8x128xf32> -> vector<8x128xf32>
    %cst_19 = arith.constant dense<0.000000e+00> : vector<8x128xf32>
    %66 = tpu.matmul %44, %2, %cst_19 {dimension_numbers = #tpu.dot_dimension_numbers<[1], [0], [0], [1], [0, 0, 1, 1], [], []>} : vector<8x32xf32>, vector<32x128xf32>, vector<8x128xf32> -> vector<8x128xf32>
    %67 = arith.addf %65, %66 : vector<8x128xf32>
    %68 = vector.broadcast %3 : vector<1x128xf32> to vector<8x128xf32>
    %69 = arith.addf %67, %68 : vector<8x128xf32>
    %70 = arith.negf %69 : vector<8x128xf32>
    %71 = math.exp %70 : vector<8x128xf32>
    %cst_20 = arith.constant 1.000000e+00 : f32
    %72 = vector.broadcast %cst_20 : f32 to vector<8x128xf32>
    %73 = arith.addf %72, %71 : vector<8x128xf32>
    %74 = arith.divf %72, %73 : vector<8x128xf32>
    %75 = math.tanh %69 : vector<8x128xf32>
    %76 = vector.extract_strided_slice %74 {offsets = [0, 0], sizes = [8, 32], strides = [1, 1]} : vector<8x128xf32> to vector<8x32xf32>
    %77 = vector.extract_strided_slice %74 {offsets = [0, 32], sizes = [8, 32], strides = [1, 1]} : vector<8x128xf32> to vector<8x32xf32>
    %78 = vector.extract_strided_slice %75 {offsets = [0, 64], sizes = [8, 32], strides = [1, 1]} : vector<8x128xf32> to vector<8x32xf32>
    %79 = vector.extract_strided_slice %74 {offsets = [0, 96], sizes = [8, 32], strides = [1, 1]} : vector<8x128xf32> to vector<8x32xf32>
    %80 = arith.mulf %77, %42 : vector<8x32xf32>
    %81 = arith.mulf %76, %78 : vector<8x32xf32>
    %82 = arith.addf %80, %81 : vector<8x32xf32>
    %83 = math.tanh %82 : vector<8x32xf32>
    %84 = arith.mulf %79, %83 : vector<8x32xf32>
    %c2_i32 = arith.constant 2 : i32
    %85 = arith.index_cast %c2_i32 : i32 to index
    %c0_21 = arith.constant 0 : index
    %c0_22 = arith.constant 0 : index
    %86 = vector.load %arg0[%85, %c0_21, %c0_22] : memref<8x8x128xf32, #tpu.memory_space<vmem>>, vector<1x8x128xf32>
    %87 = vector.shape_cast %86 : vector<1x8x128xf32> to vector<8x128xf32>
    %cst_23 = arith.constant dense<0.000000e+00> : vector<8x128xf32>
    %88 = tpu.matmul %64, %0, %cst_23 {dimension_numbers = #tpu.dot_dimension_numbers<[1], [0], [0], [1], [0, 0, 1, 1], [], []>} : vector<8x32xf32>, vector<32x128xf32>, vector<8x128xf32> -> vector<8x128xf32>
    %89 = arith.addf %87, %88 : vector<8x128xf32>
    %90 = arith.negf %89 : vector<8x128xf32>
    %91 = math.exp %90 : vector<8x128xf32>
    %cst_24 = arith.constant 1.000000e+00 : f32
    %92 = vector.broadcast %cst_24 : f32 to vector<8x128xf32>
    %93 = arith.addf %92, %91 : vector<8x128xf32>
    %94 = arith.divf %92, %93 : vector<8x128xf32>
    %95 = math.tanh %89 : vector<8x128xf32>
    %96 = vector.extract_strided_slice %94 {offsets = [0, 0], sizes = [8, 32], strides = [1, 1]} : vector<8x128xf32> to vector<8x32xf32>
    %97 = vector.extract_strided_slice %94 {offsets = [0, 32], sizes = [8, 32], strides = [1, 1]} : vector<8x128xf32> to vector<8x32xf32>
    %98 = vector.extract_strided_slice %95 {offsets = [0, 64], sizes = [8, 32], strides = [1, 1]} : vector<8x128xf32> to vector<8x32xf32>
    %99 = vector.extract_strided_slice %94 {offsets = [0, 96], sizes = [8, 32], strides = [1, 1]} : vector<8x128xf32> to vector<8x32xf32>
    %100 = arith.mulf %97, %62 : vector<8x32xf32>
    %101 = arith.mulf %96, %98 : vector<8x32xf32>
    %102 = arith.addf %100, %101 : vector<8x32xf32>
    %103 = math.tanh %102 : vector<8x32xf32>
    %104 = arith.mulf %99, %103 : vector<8x32xf32>
    %cst_25 = arith.constant dense<0.000000e+00> : vector<8x128xf32>
    %105 = tpu.matmul %104, %1, %cst_25 {dimension_numbers = #tpu.dot_dimension_numbers<[1], [0], [0], [1], [0, 0, 1, 1], [], []>} : vector<8x32xf32>, vector<32x128xf32>, vector<8x128xf32> -> vector<8x128xf32>
    %cst_26 = arith.constant dense<0.000000e+00> : vector<8x128xf32>
    %106 = tpu.matmul %84, %2, %cst_26 {dimension_numbers = #tpu.dot_dimension_numbers<[1], [0], [0], [1], [0, 0, 1, 1], [], []>} : vector<8x32xf32>, vector<32x128xf32>, vector<8x128xf32> -> vector<8x128xf32>
    %107 = arith.addf %105, %106 : vector<8x128xf32>
    %108 = vector.broadcast %3 : vector<1x128xf32> to vector<8x128xf32>
    %109 = arith.addf %107, %108 : vector<8x128xf32>
    %110 = arith.negf %109 : vector<8x128xf32>
    %111 = math.exp %110 : vector<8x128xf32>
    %cst_27 = arith.constant 1.000000e+00 : f32
    %112 = vector.broadcast %cst_27 : f32 to vector<8x128xf32>
    %113 = arith.addf %112, %111 : vector<8x128xf32>
    %114 = arith.divf %112, %113 : vector<8x128xf32>
    %115 = math.tanh %109 : vector<8x128xf32>
    %116 = vector.extract_strided_slice %114 {offsets = [0, 0], sizes = [8, 32], strides = [1, 1]} : vector<8x128xf32> to vector<8x32xf32>
    %117 = vector.extract_strided_slice %114 {offsets = [0, 32], sizes = [8, 32], strides = [1, 1]} : vector<8x128xf32> to vector<8x32xf32>
    %118 = vector.extract_strided_slice %115 {offsets = [0, 64], sizes = [8, 32], strides = [1, 1]} : vector<8x128xf32> to vector<8x32xf32>
    %119 = vector.extract_strided_slice %114 {offsets = [0, 96], sizes = [8, 32], strides = [1, 1]} : vector<8x128xf32> to vector<8x32xf32>
    %120 = arith.mulf %117, %82 : vector<8x32xf32>
    %121 = arith.mulf %116, %118 : vector<8x32xf32>
    %122 = arith.addf %120, %121 : vector<8x32xf32>
    %123 = math.tanh %122 : vector<8x32xf32>
    %124 = arith.mulf %119, %123 : vector<8x32xf32>
    %c3_i32 = arith.constant 3 : i32
    %125 = arith.index_cast %c3_i32 : i32 to index
    %c0_28 = arith.constant 0 : index
    %c0_29 = arith.constant 0 : index
    %126 = vector.load %arg0[%125, %c0_28, %c0_29] : memref<8x8x128xf32, #tpu.memory_space<vmem>>, vector<1x8x128xf32>
    %127 = vector.shape_cast %126 : vector<1x8x128xf32> to vector<8x128xf32>
    %cst_30 = arith.constant dense<0.000000e+00> : vector<8x128xf32>
    %128 = tpu.matmul %104, %0, %cst_30 {dimension_numbers = #tpu.dot_dimension_numbers<[1], [0], [0], [1], [0, 0, 1, 1], [], []>} : vector<8x32xf32>, vector<32x128xf32>, vector<8x128xf32> -> vector<8x128xf32>
    %129 = arith.addf %127, %128 : vector<8x128xf32>
    %130 = arith.negf %129 : vector<8x128xf32>
    %131 = math.exp %130 : vector<8x128xf32>
    %cst_31 = arith.constant 1.000000e+00 : f32
    %132 = vector.broadcast %cst_31 : f32 to vector<8x128xf32>
    %133 = arith.addf %132, %131 : vector<8x128xf32>
    %134 = arith.divf %132, %133 : vector<8x128xf32>
    %135 = math.tanh %129 : vector<8x128xf32>
    %136 = vector.extract_strided_slice %134 {offsets = [0, 0], sizes = [8, 32], strides = [1, 1]} : vector<8x128xf32> to vector<8x32xf32>
    %137 = vector.extract_strided_slice %134 {offsets = [0, 32], sizes = [8, 32], strides = [1, 1]} : vector<8x128xf32> to vector<8x32xf32>
    %138 = vector.extract_strided_slice %135 {offsets = [0, 64], sizes = [8, 32], strides = [1, 1]} : vector<8x128xf32> to vector<8x32xf32>
    %139 = vector.extract_strided_slice %134 {offsets = [0, 96], sizes = [8, 32], strides = [1, 1]} : vector<8x128xf32> to vector<8x32xf32>
    %140 = arith.mulf %137, %102 : vector<8x32xf32>
    %141 = arith.mulf %136, %138 : vector<8x32xf32>
    %142 = arith.addf %140, %141 : vector<8x32xf32>
    %143 = math.tanh %142 : vector<8x32xf32>
    %144 = arith.mulf %139, %143 : vector<8x32xf32>
    %cst_32 = arith.constant dense<0.000000e+00> : vector<8x128xf32>
    %145 = tpu.matmul %144, %1, %cst_32 {dimension_numbers = #tpu.dot_dimension_numbers<[1], [0], [0], [1], [0, 0, 1, 1], [], []>} : vector<8x32xf32>, vector<32x128xf32>, vector<8x128xf32> -> vector<8x128xf32>
    %cst_33 = arith.constant dense<0.000000e+00> : vector<8x128xf32>
    %146 = tpu.matmul %124, %2, %cst_33 {dimension_numbers = #tpu.dot_dimension_numbers<[1], [0], [0], [1], [0, 0, 1, 1], [], []>} : vector<8x32xf32>, vector<32x128xf32>, vector<8x128xf32> -> vector<8x128xf32>
    %147 = arith.addf %145, %146 : vector<8x128xf32>
    %148 = vector.broadcast %3 : vector<1x128xf32> to vector<8x128xf32>
    %149 = arith.addf %147, %148 : vector<8x128xf32>
    %150 = arith.negf %149 : vector<8x128xf32>
    %151 = math.exp %150 : vector<8x128xf32>
    %cst_34 = arith.constant 1.000000e+00 : f32
    %152 = vector.broadcast %cst_34 : f32 to vector<8x128xf32>
    %153 = arith.addf %152, %151 : vector<8x128xf32>
    %154 = arith.divf %152, %153 : vector<8x128xf32>
    %155 = math.tanh %149 : vector<8x128xf32>
    %156 = vector.extract_strided_slice %154 {offsets = [0, 0], sizes = [8, 32], strides = [1, 1]} : vector<8x128xf32> to vector<8x32xf32>
    %157 = vector.extract_strided_slice %154 {offsets = [0, 32], sizes = [8, 32], strides = [1, 1]} : vector<8x128xf32> to vector<8x32xf32>
    %158 = vector.extract_strided_slice %155 {offsets = [0, 64], sizes = [8, 32], strides = [1, 1]} : vector<8x128xf32> to vector<8x32xf32>
    %159 = vector.extract_strided_slice %154 {offsets = [0, 96], sizes = [8, 32], strides = [1, 1]} : vector<8x128xf32> to vector<8x32xf32>
    %160 = arith.mulf %157, %122 : vector<8x32xf32>
    %161 = arith.mulf %156, %158 : vector<8x32xf32>
    %162 = arith.addf %160, %161 : vector<8x32xf32>
    %163 = math.tanh %162 : vector<8x32xf32>
    %164 = arith.mulf %159, %163 : vector<8x32xf32>
    %c4_i32 = arith.constant 4 : i32
    %165 = arith.index_cast %c4_i32 : i32 to index
    %c0_35 = arith.constant 0 : index
    %c0_36 = arith.constant 0 : index
    %166 = vector.load %arg0[%165, %c0_35, %c0_36] : memref<8x8x128xf32, #tpu.memory_space<vmem>>, vector<1x8x128xf32>
    %167 = vector.shape_cast %166 : vector<1x8x128xf32> to vector<8x128xf32>
    %cst_37 = arith.constant dense<0.000000e+00> : vector<8x128xf32>
    %168 = tpu.matmul %144, %0, %cst_37 {dimension_numbers = #tpu.dot_dimension_numbers<[1], [0], [0], [1], [0, 0, 1, 1], [], []>} : vector<8x32xf32>, vector<32x128xf32>, vector<8x128xf32> -> vector<8x128xf32>
    %169 = arith.addf %167, %168 : vector<8x128xf32>
    %170 = arith.negf %169 : vector<8x128xf32>
    %171 = math.exp %170 : vector<8x128xf32>
    %cst_38 = arith.constant 1.000000e+00 : f32
    %172 = vector.broadcast %cst_38 : f32 to vector<8x128xf32>
    %173 = arith.addf %172, %171 : vector<8x128xf32>
    %174 = arith.divf %172, %173 : vector<8x128xf32>
    %175 = math.tanh %169 : vector<8x128xf32>
    %176 = vector.extract_strided_slice %174 {offsets = [0, 0], sizes = [8, 32], strides = [1, 1]} : vector<8x128xf32> to vector<8x32xf32>
    %177 = vector.extract_strided_slice %174 {offsets = [0, 32], sizes = [8, 32], strides = [1, 1]} : vector<8x128xf32> to vector<8x32xf32>
    %178 = vector.extract_strided_slice %175 {offsets = [0, 64], sizes = [8, 32], strides = [1, 1]} : vector<8x128xf32> to vector<8x32xf32>
    %179 = vector.extract_strided_slice %174 {offsets = [0, 96], sizes = [8, 32], strides = [1, 1]} : vector<8x128xf32> to vector<8x32xf32>
    %180 = arith.mulf %177, %142 : vector<8x32xf32>
    %181 = arith.mulf %176, %178 : vector<8x32xf32>
    %182 = arith.addf %180, %181 : vector<8x32xf32>
    %183 = math.tanh %182 : vector<8x32xf32>
    %184 = arith.mulf %179, %183 : vector<8x32xf32>
    %cst_39 = arith.constant dense<0.000000e+00> : vector<8x128xf32>
    %185 = tpu.matmul %184, %1, %cst_39 {dimension_numbers = #tpu.dot_dimension_numbers<[1], [0], [0], [1], [0, 0, 1, 1], [], []>} : vector<8x32xf32>, vector<32x128xf32>, vector<8x128xf32> -> vector<8x128xf32>
    %cst_40 = arith.constant dense<0.000000e+00> : vector<8x128xf32>
    %186 = tpu.matmul %164, %2, %cst_40 {dimension_numbers = #tpu.dot_dimension_numbers<[1], [0], [0], [1], [0, 0, 1, 1], [], []>} : vector<8x32xf32>, vector<32x128xf32>, vector<8x128xf32> -> vector<8x128xf32>
    %187 = arith.addf %185, %186 : vector<8x128xf32>
    %188 = vector.broadcast %3 : vector<1x128xf32> to vector<8x128xf32>
    %189 = arith.addf %187, %188 : vector<8x128xf32>
    %190 = arith.negf %189 : vector<8x128xf32>
    %191 = math.exp %190 : vector<8x128xf32>
    %cst_41 = arith.constant 1.000000e+00 : f32
    %192 = vector.broadcast %cst_41 : f32 to vector<8x128xf32>
    %193 = arith.addf %192, %191 : vector<8x128xf32>
    %194 = arith.divf %192, %193 : vector<8x128xf32>
    %195 = math.tanh %189 : vector<8x128xf32>
    %196 = vector.extract_strided_slice %194 {offsets = [0, 0], sizes = [8, 32], strides = [1, 1]} : vector<8x128xf32> to vector<8x32xf32>
    %197 = vector.extract_strided_slice %194 {offsets = [0, 32], sizes = [8, 32], strides = [1, 1]} : vector<8x128xf32> to vector<8x32xf32>
    %198 = vector.extract_strided_slice %195 {offsets = [0, 64], sizes = [8, 32], strides = [1, 1]} : vector<8x128xf32> to vector<8x32xf32>
    %199 = vector.extract_strided_slice %194 {offsets = [0, 96], sizes = [8, 32], strides = [1, 1]} : vector<8x128xf32> to vector<8x32xf32>
    %200 = arith.mulf %197, %162 : vector<8x32xf32>
    %201 = arith.mulf %196, %198 : vector<8x32xf32>
    %202 = arith.addf %200, %201 : vector<8x32xf32>
    %203 = math.tanh %202 : vector<8x32xf32>
    %204 = arith.mulf %199, %203 : vector<8x32xf32>
    %c5_i32 = arith.constant 5 : i32
    %205 = arith.index_cast %c5_i32 : i32 to index
    %c0_42 = arith.constant 0 : index
    %c0_43 = arith.constant 0 : index
    %206 = vector.load %arg0[%205, %c0_42, %c0_43] : memref<8x8x128xf32, #tpu.memory_space<vmem>>, vector<1x8x128xf32>
    %207 = vector.shape_cast %206 : vector<1x8x128xf32> to vector<8x128xf32>
    %cst_44 = arith.constant dense<0.000000e+00> : vector<8x128xf32>
    %208 = tpu.matmul %184, %0, %cst_44 {dimension_numbers = #tpu.dot_dimension_numbers<[1], [0], [0], [1], [0, 0, 1, 1], [], []>} : vector<8x32xf32>, vector<32x128xf32>, vector<8x128xf32> -> vector<8x128xf32>
    %209 = arith.addf %207, %208 : vector<8x128xf32>
    %210 = arith.negf %209 : vector<8x128xf32>
    %211 = math.exp %210 : vector<8x128xf32>
    %cst_45 = arith.constant 1.000000e+00 : f32
    %212 = vector.broadcast %cst_45 : f32 to vector<8x128xf32>
    %213 = arith.addf %212, %211 : vector<8x128xf32>
    %214 = arith.divf %212, %213 : vector<8x128xf32>
    %215 = math.tanh %209 : vector<8x128xf32>
    %216 = vector.extract_strided_slice %214 {offsets = [0, 0], sizes = [8, 32], strides = [1, 1]} : vector<8x128xf32> to vector<8x32xf32>
    %217 = vector.extract_strided_slice %214 {offsets = [0, 32], sizes = [8, 32], strides = [1, 1]} : vector<8x128xf32> to vector<8x32xf32>
    %218 = vector.extract_strided_slice %215 {offsets = [0, 64], sizes = [8, 32], strides = [1, 1]} : vector<8x128xf32> to vector<8x32xf32>
    %219 = vector.extract_strided_slice %214 {offsets = [0, 96], sizes = [8, 32], strides = [1, 1]} : vector<8x128xf32> to vector<8x32xf32>
    %220 = arith.mulf %217, %182 : vector<8x32xf32>
    %221 = arith.mulf %216, %218 : vector<8x32xf32>
    %222 = arith.addf %220, %221 : vector<8x32xf32>
    %223 = math.tanh %222 : vector<8x32xf32>
    %224 = arith.mulf %219, %223 : vector<8x32xf32>
    %cst_46 = arith.constant dense<0.000000e+00> : vector<8x128xf32>
    %225 = tpu.matmul %224, %1, %cst_46 {dimension_numbers = #tpu.dot_dimension_numbers<[1], [0], [0], [1], [0, 0, 1, 1], [], []>} : vector<8x32xf32>, vector<32x128xf32>, vector<8x128xf32> -> vector<8x128xf32>
    %cst_47 = arith.constant dense<0.000000e+00> : vector<8x128xf32>
    %226 = tpu.matmul %204, %2, %cst_47 {dimension_numbers = #tpu.dot_dimension_numbers<[1], [0], [0], [1], [0, 0, 1, 1], [], []>} : vector<8x32xf32>, vector<32x128xf32>, vector<8x128xf32> -> vector<8x128xf32>
    %227 = arith.addf %225, %226 : vector<8x128xf32>
    %228 = vector.broadcast %3 : vector<1x128xf32> to vector<8x128xf32>
    %229 = arith.addf %227, %228 : vector<8x128xf32>
    %230 = arith.negf %229 : vector<8x128xf32>
    %231 = math.exp %230 : vector<8x128xf32>
    %cst_48 = arith.constant 1.000000e+00 : f32
    %232 = vector.broadcast %cst_48 : f32 to vector<8x128xf32>
    %233 = arith.addf %232, %231 : vector<8x128xf32>
    %234 = arith.divf %232, %233 : vector<8x128xf32>
    %235 = math.tanh %229 : vector<8x128xf32>
    %236 = vector.extract_strided_slice %234 {offsets = [0, 0], sizes = [8, 32], strides = [1, 1]} : vector<8x128xf32> to vector<8x32xf32>
    %237 = vector.extract_strided_slice %234 {offsets = [0, 32], sizes = [8, 32], strides = [1, 1]} : vector<8x128xf32> to vector<8x32xf32>
    %238 = vector.extract_strided_slice %235 {offsets = [0, 64], sizes = [8, 32], strides = [1, 1]} : vector<8x128xf32> to vector<8x32xf32>
    %239 = vector.extract_strided_slice %234 {offsets = [0, 96], sizes = [8, 32], strides = [1, 1]} : vector<8x128xf32> to vector<8x32xf32>
    %240 = arith.mulf %237, %202 : vector<8x32xf32>
    %241 = arith.mulf %236, %238 : vector<8x32xf32>
    %242 = arith.addf %240, %241 : vector<8x32xf32>
    %243 = math.tanh %242 : vector<8x32xf32>
    %244 = arith.mulf %239, %243 : vector<8x32xf32>
    %c6_i32 = arith.constant 6 : i32
    %245 = arith.index_cast %c6_i32 : i32 to index
    %c0_49 = arith.constant 0 : index
    %c0_50 = arith.constant 0 : index
    %246 = vector.load %arg0[%245, %c0_49, %c0_50] : memref<8x8x128xf32, #tpu.memory_space<vmem>>, vector<1x8x128xf32>
    %247 = vector.shape_cast %246 : vector<1x8x128xf32> to vector<8x128xf32>
    %cst_51 = arith.constant dense<0.000000e+00> : vector<8x128xf32>
    %248 = tpu.matmul %224, %0, %cst_51 {dimension_numbers = #tpu.dot_dimension_numbers<[1], [0], [0], [1], [0, 0, 1, 1], [], []>} : vector<8x32xf32>, vector<32x128xf32>, vector<8x128xf32> -> vector<8x128xf32>
    %249 = arith.addf %247, %248 : vector<8x128xf32>
    %250 = arith.negf %249 : vector<8x128xf32>
    %251 = math.exp %250 : vector<8x128xf32>
    %cst_52 = arith.constant 1.000000e+00 : f32
    %252 = vector.broadcast %cst_52 : f32 to vector<8x128xf32>
    %253 = arith.addf %252, %251 : vector<8x128xf32>
    %254 = arith.divf %252, %253 : vector<8x128xf32>
    %255 = math.tanh %249 : vector<8x128xf32>
    %256 = vector.extract_strided_slice %254 {offsets = [0, 0], sizes = [8, 32], strides = [1, 1]} : vector<8x128xf32> to vector<8x32xf32>
    %257 = vector.extract_strided_slice %254 {offsets = [0, 32], sizes = [8, 32], strides = [1, 1]} : vector<8x128xf32> to vector<8x32xf32>
    %258 = vector.extract_strided_slice %255 {offsets = [0, 64], sizes = [8, 32], strides = [1, 1]} : vector<8x128xf32> to vector<8x32xf32>
    %259 = vector.extract_strided_slice %254 {offsets = [0, 96], sizes = [8, 32], strides = [1, 1]} : vector<8x128xf32> to vector<8x32xf32>
    %260 = arith.mulf %257, %222 : vector<8x32xf32>
    %261 = arith.mulf %256, %258 : vector<8x32xf32>
    %262 = arith.addf %260, %261 : vector<8x32xf32>
    %263 = math.tanh %262 : vector<8x32xf32>
    %264 = arith.mulf %259, %263 : vector<8x32xf32>
    %cst_53 = arith.constant dense<0.000000e+00> : vector<8x128xf32>
    %265 = tpu.matmul %264, %1, %cst_53 {dimension_numbers = #tpu.dot_dimension_numbers<[1], [0], [0], [1], [0, 0, 1, 1], [], []>} : vector<8x32xf32>, vector<32x128xf32>, vector<8x128xf32> -> vector<8x128xf32>
    %cst_54 = arith.constant dense<0.000000e+00> : vector<8x128xf32>
    %266 = tpu.matmul %244, %2, %cst_54 {dimension_numbers = #tpu.dot_dimension_numbers<[1], [0], [0], [1], [0, 0, 1, 1], [], []>} : vector<8x32xf32>, vector<32x128xf32>, vector<8x128xf32> -> vector<8x128xf32>
    %267 = arith.addf %265, %266 : vector<8x128xf32>
    %268 = vector.broadcast %3 : vector<1x128xf32> to vector<8x128xf32>
    %269 = arith.addf %267, %268 : vector<8x128xf32>
    %270 = arith.negf %269 : vector<8x128xf32>
    %271 = math.exp %270 : vector<8x128xf32>
    %cst_55 = arith.constant 1.000000e+00 : f32
    %272 = vector.broadcast %cst_55 : f32 to vector<8x128xf32>
    %273 = arith.addf %272, %271 : vector<8x128xf32>
    %274 = arith.divf %272, %273 : vector<8x128xf32>
    %275 = math.tanh %269 : vector<8x128xf32>
    %276 = vector.extract_strided_slice %274 {offsets = [0, 0], sizes = [8, 32], strides = [1, 1]} : vector<8x128xf32> to vector<8x32xf32>
    %277 = vector.extract_strided_slice %274 {offsets = [0, 32], sizes = [8, 32], strides = [1, 1]} : vector<8x128xf32> to vector<8x32xf32>
    %278 = vector.extract_strided_slice %275 {offsets = [0, 64], sizes = [8, 32], strides = [1, 1]} : vector<8x128xf32> to vector<8x32xf32>
    %279 = vector.extract_strided_slice %274 {offsets = [0, 96], sizes = [8, 32], strides = [1, 1]} : vector<8x128xf32> to vector<8x32xf32>
    %280 = arith.mulf %277, %242 : vector<8x32xf32>
    %281 = arith.mulf %276, %278 : vector<8x32xf32>
    %282 = arith.addf %280, %281 : vector<8x32xf32>
    %283 = math.tanh %282 : vector<8x32xf32>
    %284 = arith.mulf %279, %283 : vector<8x32xf32>
    %c7_i32 = arith.constant 7 : i32
    %285 = arith.index_cast %c7_i32 : i32 to index
    %c0_56 = arith.constant 0 : index
    %c0_57 = arith.constant 0 : index
    %286 = vector.load %arg0[%285, %c0_56, %c0_57] : memref<8x8x128xf32, #tpu.memory_space<vmem>>, vector<1x8x128xf32>
    %287 = vector.shape_cast %286 : vector<1x8x128xf32> to vector<8x128xf32>
    %cst_58 = arith.constant dense<0.000000e+00> : vector<8x128xf32>
    %288 = tpu.matmul %264, %0, %cst_58 {dimension_numbers = #tpu.dot_dimension_numbers<[1], [0], [0], [1], [0, 0, 1, 1], [], []>} : vector<8x32xf32>, vector<32x128xf32>, vector<8x128xf32> -> vector<8x128xf32>
    %289 = arith.addf %287, %288 : vector<8x128xf32>
    %290 = arith.negf %289 : vector<8x128xf32>
    %291 = math.exp %290 : vector<8x128xf32>
    %cst_59 = arith.constant 1.000000e+00 : f32
    %292 = vector.broadcast %cst_59 : f32 to vector<8x128xf32>
    %293 = arith.addf %292, %291 : vector<8x128xf32>
    %294 = arith.divf %292, %293 : vector<8x128xf32>
    %295 = math.tanh %289 : vector<8x128xf32>
    %296 = vector.extract_strided_slice %294 {offsets = [0, 0], sizes = [8, 32], strides = [1, 1]} : vector<8x128xf32> to vector<8x32xf32>
    %297 = vector.extract_strided_slice %294 {offsets = [0, 32], sizes = [8, 32], strides = [1, 1]} : vector<8x128xf32> to vector<8x32xf32>
    %298 = vector.extract_strided_slice %295 {offsets = [0, 64], sizes = [8, 32], strides = [1, 1]} : vector<8x128xf32> to vector<8x32xf32>
    %299 = vector.extract_strided_slice %294 {offsets = [0, 96], sizes = [8, 32], strides = [1, 1]} : vector<8x128xf32> to vector<8x32xf32>
    %300 = arith.mulf %297, %262 : vector<8x32xf32>
    %301 = arith.mulf %296, %298 : vector<8x32xf32>
    %302 = arith.addf %300, %301 : vector<8x32xf32>
    %303 = math.tanh %302 : vector<8x32xf32>
    %304 = arith.mulf %299, %303 : vector<8x32xf32>
    %cst_60 = arith.constant dense<0.000000e+00> : vector<8x128xf32>
    %305 = tpu.matmul %304, %1, %cst_60 {dimension_numbers = #tpu.dot_dimension_numbers<[1], [0], [0], [1], [0, 0, 1, 1], [], []>} : vector<8x32xf32>, vector<32x128xf32>, vector<8x128xf32> -> vector<8x128xf32>
    %cst_61 = arith.constant dense<0.000000e+00> : vector<8x128xf32>
    %306 = tpu.matmul %284, %2, %cst_61 {dimension_numbers = #tpu.dot_dimension_numbers<[1], [0], [0], [1], [0, 0, 1, 1], [], []>} : vector<8x32xf32>, vector<32x128xf32>, vector<8x128xf32> -> vector<8x128xf32>
    %307 = arith.addf %305, %306 : vector<8x128xf32>
    %308 = vector.broadcast %3 : vector<1x128xf32> to vector<8x128xf32>
    %309 = arith.addf %307, %308 : vector<8x128xf32>
    %310 = arith.negf %309 : vector<8x128xf32>
    %311 = math.exp %310 : vector<8x128xf32>
    %cst_62 = arith.constant 1.000000e+00 : f32
    %312 = vector.broadcast %cst_62 : f32 to vector<8x128xf32>
    %313 = arith.addf %312, %311 : vector<8x128xf32>
    %314 = arith.divf %312, %313 : vector<8x128xf32>
    %315 = math.tanh %309 : vector<8x128xf32>
    %316 = vector.extract_strided_slice %314 {offsets = [0, 0], sizes = [8, 32], strides = [1, 1]} : vector<8x128xf32> to vector<8x32xf32>
    %317 = vector.extract_strided_slice %314 {offsets = [0, 32], sizes = [8, 32], strides = [1, 1]} : vector<8x128xf32> to vector<8x32xf32>
    %318 = vector.extract_strided_slice %315 {offsets = [0, 64], sizes = [8, 32], strides = [1, 1]} : vector<8x128xf32> to vector<8x32xf32>
    %319 = vector.extract_strided_slice %314 {offsets = [0, 96], sizes = [8, 32], strides = [1, 1]} : vector<8x128xf32> to vector<8x32xf32>
    %320 = arith.mulf %317, %282 : vector<8x32xf32>
    %321 = arith.mulf %316, %318 : vector<8x32xf32>
    %322 = arith.addf %320, %321 : vector<8x32xf32>
    %323 = math.tanh %322 : vector<8x32xf32>
    %324 = arith.mulf %319, %323 : vector<8x32xf32>
    %c8_i32 = arith.constant 8 : i32
    %c0_63 = arith.constant 0 : index
    %c0_64 = arith.constant 0 : index
    %325 = vector.load %arg5[%c0_63, %c0_64] : memref<32x32xf32, #tpu.memory_space<vmem>>, vector<32x32xf32>
    %cst_65 = arith.constant dense<0.000000e+00> : vector<8x32xf32>
    %326 = tpu.matmul %324, %325, %cst_65 {dimension_numbers = #tpu.dot_dimension_numbers<[1], [0], [0], [1], [0, 0, 1, 1], [], []>} : vector<8x32xf32>, vector<32x32xf32>, vector<8x32xf32> -> vector<8x32xf32>
    %c0_66 = arith.constant 0 : index
    %c0_67 = arith.constant 0 : index
    %327 = vector.load %arg6[%c0_66, %c0_67] : memref<1x32xf32, #tpu.memory_space<vmem>>, vector<1x32xf32>
    %328 = vector.broadcast %327 : vector<1x32xf32> to vector<8x32xf32>
    %329 = arith.addf %326, %328 : vector<8x32xf32>
    %c0_68 = arith.constant 0 : index
    %c0_69 = arith.constant 0 : index
    %330 = vector.load %arg7[%c0_68, %c0_69] : memref<1x32xf32, #tpu.memory_space<vmem>>, vector<1x32xf32>
    %331 = vector.broadcast %330 : vector<1x32xf32> to vector<8x32xf32>
    %332 = arith.mulf %329, %331 : vector<8x32xf32>
    %cst_70 = arith.constant dense<0.000000e+00> : vector<8xf32>
    %333 = vector.multi_reduction <add>, %332, %cst_70 [1] : vector<8x32xf32> to vector<8xf32>
    %334 = vector.shape_cast %333 : vector<8xf32> to vector<8x1xf32>
    %c0_71 = arith.constant 0 : index
    %c0_72 = arith.constant 0 : index
    %335 = vector.load %arg8[%c0_71, %c0_72] : memref<1x1xf32, #tpu.memory_space<vmem>>, vector<1x1xf32>
    %336 = vector.broadcast %335 : vector<1x1xf32> to vector<8x1xf32>
    %337 = arith.addf %334, %336 : vector<8x1xf32>
    %338 = arith.negf %337 : vector<8x1xf32>
    %339 = math.exp %338 : vector<8x1xf32>
    %cst_73 = arith.constant 1.000000e+00 : f32
    %340 = vector.broadcast %cst_73 : f32 to vector<8x1xf32>
    %341 = arith.addf %340, %339 : vector<8x1xf32>
    %342 = arith.divf %340, %341 : vector<8x1xf32>
    %c0_74 = arith.constant 0 : index
    %c0_75 = arith.constant 0 : index
    %343 = vector.load %arg9[%c0_74, %c0_75] : memref<8x1xf32, #tpu.memory_space<vmem>>, vector<8x1xf32>
    tpu.vector_store %arg9[%c0_74, %c0_75], %342 {strides = array<i32>} : memref<8x1xf32, #tpu.memory_space<vmem>>, vector<8x1xf32>,
    return
  }
}

</mosaic_0001>

<bundles_post_ra>
// kernel: tpu_custom_call.1
= control target key start
LH: loop header
LB: loop body
LE: loop exit
PB: predicated region body
PF: predicated region fallthrough
CT: control target
= control target key end

     0   :  { %s2064_s0 = inlined_call_operand.hbm [shape: f32[8,8,128], index: 0, kind: input, shape index: {}]   ;;  %s2065_s1 = inlined_call_operand.hbm [shape: f32[32,128], index: 1, kind: input, shape index: {}]   ;;  %s2066_s2 = inlined_call_operand.hbm [shape: f32[32,128], index: 2, kind: input, shape index: {}]   ;;  %s2067_s3 = inlined_call_operand.hbm [shape: f32[32,128], index: 3, kind: input, shape index: {}]   ;;  %s2068_s4 = inlined_call_operand.vmem [shape: f32[1,128], index: 4, kind: input, shape index: {}]   ;;  %s2069_s5 = inlined_call_operand.hbm [shape: f32[32,32], index: 5, kind: input, shape index: {}]   ;;  %s2070_s6 = inlined_call_operand.vmem [shape: f32[1,32], index: 6, kind: input, shape index: {}]   ;;  %s2071_s7 = inlined_call_operand.vmem [shape: f32[1,32], index: 7, kind: input, shape index: {}]   ;;  %s2072_s8 = inlined_call_operand.<no memory space> [shape: f32[1,1], index: 8, kind: input, shape index: {}]   ;;  %s2073_s9 = inlined_call_operand.vmem [shape: f32[8,1], index: 9, kind: output, shape index: {}]  }
   0x1   :  { %v14_v0 = vstv %s2072_s8 }
   0x2   :  { %15 = vst [vmem:[#allocation2] sm:$0x1] %v14_v0 }
   0x3   :  { %16 = vsyncpa [#allocation4], 0 }
   0x4   :  { %17 = vsyncpa [#allocation6], 0 }
   0x5   :  { %18 = vsyncpa [#allocation9], 0  ;;  %s36_s13 = sshll.u32 %s2065_s1, 4  ;;  %s1697_s14 = smov [#allocation5]   ;;  %s37_s13 = int_to_ptr.hbm [resolvable:$true] %s36_s13 }
   0x6   :  { %s38_s15 = sshll.u32 %s1697_s14, 4  ;;  %s62_s18 = sshll.u32 %s2067_s3, 4  ;;  %s39_s15 = int_to_ptr.vmem [resolvable:$true] %s38_s15  ;;  %s63_s18 = int_to_ptr.hbm [resolvable:$true] %s62_s18 }
   0x7   :  { %s1698_s19 = smov 128   ;;  %s1699_s20 = smov 8  }
   0x8   :  { %44 = dma.hbm_to_vmem [thread:$0]  %s37_s13, 512, %s39_s15, [#allocation6], %s1698_s19, %s1698_s19, %s1699_s20  }
   0x9   :  { %s1700_s8 = smov [#allocation8]   ;;  %s23_s24 = sshll.u32 %s2064_s0, 4  ;;  %s24_s24 = int_to_ptr.hbm [resolvable:$true] %s23_s24 }
   0xa   :  { %s64_s21 = sshll.u32 %s1700_s8, 4  ;;  %s49_s26 = sshll.u32 %s2066_s2, 4  ;;  %s65_s21 = int_to_ptr.vmem [resolvable:$true] %s64_s21  ;;  %s50_s26 = int_to_ptr.hbm [resolvable:$true] %s49_s26 }
   0xb   :  { %70 = dma.hbm_to_vmem [thread:$0]  %s63_s18, 512, %s65_s21, [#allocation9], %s1698_s19, %s1698_s19, %s1699_s20  }
   0xc   :  { %s1701_s27 = smov [#allocation3]   ;;  %s1702_s3 = smov [#allocation7]  }
   0xd   :  { %s25_s28 = sshll.u32 %s1701_s27, 4  ;;  %s51_s29 = sshll.u32 %s1702_s3, 4  ;;  %s26_s28 = int_to_ptr.vmem [resolvable:$true] %s25_s28  ;;  %s52_s29 = int_to_ptr.vmem [resolvable:$true] %s51_s29 }
   0xe   :  { %31 = dma.hbm_to_vmem [thread:$0]  %s24_s24, 1024, %s26_s28, [#allocation4], %s1698_s19, %s1698_s19, %s1699_s20  }
   0xf   :  { %s77_s11 = sshll.u32 %s2069_s5, 4  ;;  %s1703_s0 = smov [#allocation10]   ;;  %s78_s11 = int_to_ptr.hbm [resolvable:$true] %s77_s11 }
  0x10   :  { %57 = dma.hbm_to_vmem [thread:$0]  %s50_s26, 512, %s52_s29, [#allocation6], %s1698_s19, %s1698_s19, %s1699_s20  }
  0x11   :  { %s79_s12 = sshll.u32 %s1703_s0, 4  ;;  %s80_s12 = int_to_ptr.vmem [resolvable:$true] %s79_s12 }
  0x12   :  { %85 = dma.hbm_to_vmem [thread:$0]  %s78_s11, 512, %s80_s12, [#allocation9], %s1698_s19, %s1698_s19, %s1699_s20  }
  0x13   :  { %1691 = dma.done.wait [#allocation4], 1024  }
  0x14   :  { %1692 = vsyncadd [#allocation4], 4294966272 }
  0x15   :  { %1693 = dma.done.wait [#allocation6], 1024  }
  0x16   :  { %1694 = vsyncadd [#allocation6], 4294966272 }
  0x17   :  { %1695 = dma.done.wait [#allocation9], 1024  }
  0x18   :  { %1696 = vsyncadd [#allocation9], 4294966272  ;;  %v1775_v1 = vld [vmem:[#allocation5 + $0x18] sm:$0xff]  ;;  %v1777_v2 = vld [vmem:[#allocation5 + $0x10] sm:$0xff]  ;;  %v1704_v5 = vmov 0.0   ;;  %s1705_s2 = smov 64  }
  0x19   :  { %142 = vmatpush.msra.mxu0 %v1775_v1  ;;  %v1780_v3 = vld [vmem:[#allocation5 + $0x8] sm:$0xff]  ;;  %288 = vmatpush.msra.mxu3 %v1775_v1  ;;  %v1785_v4 = vld [vmem:[#allocation5] sm:$0xff]  ;;  %s1706_s5 = smov 32   ;;  %v1798_v29 = vld [vmem:[#allocation7 + $0x18] sm:$0xff]  ;;  %vm126_vm4 = vcmask 261120  }
  0x1a   :  { %v125_v6 = vld [vmem:[#allocation3] sm:$0xff]  ;;  %v1800_v30 = vld [vmem:[#allocation7 + $0x10] sm:$0xff]  ;;  %225 = vmatpush.msra.mxu2 %v1798_v29  ;;  %v1803_v31 = vld [vmem:[#allocation8 + $0x18] sm:$0xff] }
  0x1b   :  { %143 = vmatpush.msra.mxu0 %v1777_v2  ;;  %289 = vmatpush.msra.mxu3 %v1777_v2  ;;  %v1805_v32 = vld [vmem:[#allocation7 + $0x8] sm:$0xff]  ;;  %v1811_v33 = vld [vmem:[#allocation7] sm:$0xff]  ;;  %v1820_v36 = vld [vmem:[#allocation8 + $0x10] sm:$0xff] }
  0x1c   :  { %200 = vmatpush.msra.mxu1 %v1803_v31  ;;  %226 = vmatpush.msra.mxu2 %v1800_v30  ;;  %v1822_v37 = vld [vmem:[#allocation8 + $0x8] sm:$0xff]  ;;  %v1826_v38 = vld [vmem:[#allocation8] sm:$0xff]  ;;  %v1861_v41 = vld [vmem:[%s2068_s4] ss:$0 sm:$0xff] }
  0x1d   :  { %144 = vmatpush.msra.mxu0 %v1780_v3  ;;  %290 = vmatpush.msra.mxu3 %v1780_v3  ;;  %v275_v45 = vld [vmem:[#allocation3 + $0x8] sm:$0xff] }
  0x1e   :  { %227 = vmatpush.msra.mxu2 %v1805_v32  ;;  %201 = vmatpush.msra.mxu1 %v1820_v36 }
  0x1f   :  { %145 = vmatpush.msra.mxu0 %v1785_v4  ;;  %291 = vmatpush.msra.mxu3 %v1785_v4 }
  0x20   :  { %146 = vmatmul.f32.vlgmr.msra.gmra.mxu0 %v1704_v5  ;;  %228 = vmatpush.msra.mxu2 %v1811_v33 }
  0x21   :  { %351 = vmatpush.msrb.mxu0 %v1803_v31  ;;  %499 = vmatpush.msrb.mxu3 %v1803_v31 }
  0x22   :  { %436 = vmatpush.msrb.mxu2 %v1775_v1  ;;  %202 = vmatpush.msra.mxu1 %v1822_v37 }
  0x23   :  { %352 = vmatpush.msrb.mxu0 %v1820_v36  ;;  %500 = vmatpush.msrb.mxu3 %v1820_v36 }
  0x24   :  { %437 = vmatpush.msrb.mxu2 %v1777_v2  ;;  %203 = vmatpush.msra.mxu1 %v1826_v38 }
  0x25   :  { %353 = vmatpush.msrb.mxu0 %v1822_v37  ;;  %501 = vmatpush.msrb.mxu3 %v1822_v37 }
  0x26   :  { %438 = vmatpush.msrb.mxu2 %v1780_v3  ;;  %204 = vmatmul.f32.vlgmr.msra.gmra.mxu1 %v1704_v5 }
  0x27   :  { %354 = vmatpush.msrb.mxu0 %v1826_v38  ;;  %376 = vmatpush.msrb.mxu1 %v1798_v29 }
  0x28   :  { %439 = vmatpush.msrb.mxu2 %v1785_v4  ;;  %502 = vmatpush.msrb.mxu3 %v1826_v38 }
  0x29   :  { %524 = vmatpush.msra.mxu0 %v1798_v29  ;;  %377 = vmatpush.msrb.mxu1 %v1800_v30 }
  0x2b   :  { %525 = vmatpush.msra.mxu0 %v1800_v30  ;;  %378 = vmatpush.msrb.mxu1 %v1805_v32 }
  0x2d   :  { %526 = vmatpush.msra.mxu0 %v1805_v32  ;;  %379 = vmatpush.msrb.mxu1 %v1811_v33 }
  0x2f   :  { %527 = vmatpush.msra.mxu0 %v1811_v33  ;;  %584 = vmatpush.msra.mxu1 %v1775_v1 }
  0x31   :  { %585 = vmatpush.msra.mxu1 %v1777_v2 }
  0x33   :  { %586 = vmatpush.msra.mxu1 %v1780_v3 }
  0x35   :  { %587 = vmatpush.msra.mxu1 %v1785_v4 }
  0x9d   :  { %v147_v7 = vpop.f32.mrf.mxu0 }
  0x9e   :  { %v150_v8 = vadd.f32 %v147_v7, %v125_v6 }
  0xa0   :  { %1438 = vtanh.f32 %v150_v8  ;;  %v1384_v10 = vmul.f32 -1.442695, %v150_v8 }
  0xa2   :  { %1440 = vpow2.f32 %v1384_v10 }
  0xa3   :  { %v205_v40 = vpop.f32.mrf.mxu1 }
  0xa6   :  { %v1439_v9 = vpop.eup %1438 }
  0xa7   :  { %173 = vrot.lane.b32.xlu0 %v1439_v9, %s1705_s2 }
  0xa8   :  { %v1441_v11 = vpop.eup %1440 }
  0xa9   :  { %v154_v12 = vadd.f32 1.0, %v1441_v11 }
  0xab   :  { %1442 = vrcp.f32 %v154_v12  ;;  %v166_v18 = vand.u32 2147483648, %v154_v12  ;;  %vm160_vm1 = vweird.f32 %v154_v12  ;;  %v164_v19 = vand.u32 2147483647, %v154_v12 }
  0xad   :  { %v167_v21 = vor.u32 1.1754944e-38, %v166_v18  ;;  %vm165_vm3 = vcmp.eq.f32.partialorder %v164_v19, 8.507059e+37 }
  0xb1   :  { %v1443_v13 = vpop.eup %1442 }
  0xb2   :  { %v156_v14 = vmul.f32 %v1443_v13, %v154_v12  ;;  %vm161_vm0 = vweird.f32 %v1443_v13 }
  0xb3   :  { %vm162_vm2 = vmor %vm160_vm1, %vm161_vm0 }
  0xb4   :  { %v157_v15 = vsub.f32 1.0, %v156_v14 }
  0xb6   :  { %v158_v16 = vmul.f32 %v1443_v13, %v157_v15 }
  0xb8   :  { %v159_v17 = vadd.f32 %v1443_v13, %v158_v16 }
  0xba   :  { %v163_v20 = vsel %vm162_vm2, %v1443_v13, %v159_v17 }
  0xbb   :  { %v168_v23 = vsel %vm165_vm3, %v167_v21, %v163_v20 }
  0xbc   :  { %v171_v25 = vmul.f32 0.0, %v168_v23 }
 0x119   :  { %v174_v22 = vpop.permute.xlu0 %173 }
 0x11a   :  { %v176_v24 = vmul.f32 %v174_v22, %v168_v23 }
 0x11c   :  { %178 = vrot.lane.b32.xlu0 %v176_v24, %s1706_s5 }
 0x18e   :  { %v179_v26 = vpop.permute.xlu0 %178 }
 0x18f   :  { %v1794_v27 = vadd.f32 %v179_v26, %v171_v25 }
 0x191   :  { %1444 = vtanh.f32 %v1794_v27 }
 0x197   :  { %v1445_v28 = vpop.eup %1444 }
 0x198   :  { %184 = vrot.lane.b32.xlu1 %v1445_v28, %s1705_s2 }
 0x20a   :  { %v185_v34 = vpop.permute.xlu1 %184 }
 0x20b   :  { %v187_v35 = vmul.f32 %v185_v34, %v168_v23 }
 0x20d   :  { %209 = vrot.lane.b32.xlu1 %v187_v35, %s1706_s5 }
 0x27f   :  { %v210_v39 = vpop.permute.xlu1 %209 }
 0x280   :  { %1385 = vmatmul.msk.f32.vlgmr.msra.gmra.mxu2 %vm126_vm4, %v210_v39  ;;  %1387 = vmatmul.msk.f32.vlgmr.msra.gmra.mxu3 %vm126_vm4, %v210_v39 }
 0x281   :  { %647 = vmatpush.msra.mxu2 %v1803_v31  ;;  %672 = vmatpush.msra.mxu3 %v1798_v29 }
 0x283   :  { %648 = vmatpush.msra.mxu2 %v1820_v36  ;;  %673 = vmatpush.msra.mxu3 %v1800_v30 }
 0x285   :  { %649 = vmatpush.msra.mxu2 %v1822_v37  ;;  %674 = vmatpush.msra.mxu3 %v1805_v32 }
 0x287   :  { %650 = vmatpush.msra.mxu2 %v1826_v38  ;;  %675 = vmatpush.msra.mxu3 %v1811_v33 }
 0x303   :  { %v230_v42 = vpop.f32.mrf.mxu2  ;;  %v293_v46 = vpop.f32.mrf.mxu3 }
 0x304   :  { %v231_v43 = vadd.f32 %v230_v42, %v205_v40  ;;  %v296_v47 = vadd.f32 %v293_v46, %v275_v45 }
 0x306   :  { %v236_v44 = vadd.f32 %v1861_v41, %v231_v43  ;;  %v1388_v51 = vmul.f32 -1.442695, %v296_v47 }
 0x308   :  { %1446 = vtanh.f32 %v236_v44  ;;  %v1386_v50 = vmul.f32 -1.442695, %v236_v44 }
 0x309   :  { %1448 = vtanh.f32 %v296_v47  ;;  %v423_v47 = vld [vmem:[#allocation3 + $0x10] sm:$0xff] }
 0x30a   :  { %1450 = vpow2.f32 %v1386_v50 }
 0x30b   :  { %1452 = vpow2.f32 %v1388_v51 }
 0x30e   :  { %v1447_v48 = vpop.eup %1446 }
 0x30f   :  { %259 = vrot.lane.b32.xlu2 %v1447_v48, %s1705_s2  ;;  %v1449_v49 = vpop.eup %1448 }
 0x310   :  { %v1451_v52 = vpop.eup %1450 }
 0x311   :  { %v240_v53 = vadd.f32 1.0, %v1451_v52  ;;  %v1453_v54 = vpop.eup %1452 }
 0x312   :  { %v300_v55 = vadd.f32 1.0, %v1453_v54 }
 0x313   :  { %1454 = vrcp.f32 %v240_v53  ;;  %v252_v0 = vand.u32 2147483648, %v240_v53  ;;  %vm246_vm6 = vweird.f32 %v240_v53  ;;  %v250_v5 = vand.u32 2147483647, %v240_v53 }
 0x314   :  { %1456 = vrcp.f32 %v300_v55  ;;  %v312_v13 = vand.u32 2147483648, %v300_v55  ;;  %vm306_vm10 = vweird.f32 %v300_v55  ;;  %v310_v14 = vand.u32 2147483647, %v300_v55 }
 0x315   :  { %v253_v8 = vor.u32 1.1754944e-38, %v252_v0  ;;  %vm251_vm8 = vcmp.eq.f32.partialorder %v250_v5, 8.507059e+37 }
 0x316   :  { %v313_v16 = vor.u32 1.1754944e-38, %v312_v13  ;;  %vm311_vm12 = vcmp.eq.f32.partialorder %v310_v14, 8.507059e+37 }
 0x317   :  { %319 = vrot.lane.b32.xlu2 %v1449_v49, %s1705_s2 }
 0x319   :  { %v1455_v56 = vpop.eup %1454 }
 0x31a   :  { %v242_v57 = vmul.f32 %v1455_v56, %v240_v53  ;;  %v1457_v59 = vpop.eup %1456  ;;  %vm247_vm5 = vweird.f32 %v1455_v56 }
 0x31b   :  { %v302_v61 = vmul.f32 %v1457_v59, %v300_v55  ;;  %vm248_vm7 = vmor %vm246_vm6, %vm247_vm5  ;;  %vm307_vm9 = vweird.f32 %v1457_v59 }
 0x31c   :  { %v243_v58 = vsub.f32 1.0, %v242_v57  ;;  %vm308_vm11 = vmor %vm306_vm10, %vm307_vm9 }
 0x31d   :  { %v303_v63 = vsub.f32 1.0, %v302_v61 }
 0x31e   :  { %v244_v60 = vmul.f32 %v1455_v56, %v243_v58 }
 0x31f   :  { %v304_v7 = vmul.f32 %v1457_v59, %v303_v63 }
 0x320   :  { %v245_v62 = vadd.f32 %v1455_v56, %v244_v60 }
 0x321   :  { %v305_v12 = vadd.f32 %v1457_v59, %v304_v7 }
 0x322   :  { %v249_v6 = vsel %vm248_vm7, %v1455_v56, %v245_v62 }
 0x323   :  { %v254_v10 = vsel %vm251_vm8, %v253_v8, %v249_v6  ;;  %v309_v15 = vsel %vm308_vm11, %v1457_v59, %v305_v12 }
 0x324   :  { %v314_v17 = vsel %vm311_vm12, %v313_v16, %v309_v15  ;;  %v257_v20 = vmul.f32 0.0, %v254_v10 }
 0x325   :  { %v317_v23 = vmul.f32 %v314_v17, %v1794_v27 }
 0x369   :  { %v260_v9 = vpop.permute.xlu2 %259 }
 0x36a   :  { %v262_v11 = vmul.f32 %v260_v9, %v254_v10 }
 0x36c   :  { %264 = vrot.lane.b32.xlu0 %v262_v11, %s1706_s5 }
 0x371   :  { %v320_v18 = vpop.permute.xlu2 %319 }
 0x372   :  { %v322_v19 = vmul.f32 %v320_v18, %v314_v17 }
 0x374   :  { %324 = vrot.lane.b32.xlu1 %v322_v19, %s1706_s5 }
 0x3de   :  { %v265_v21 = vpop.permute.xlu0 %264 }
 0x3df   :  { %v1868_v22 = vadd.f32 %v265_v21, %v257_v20 }
 0x3e1   :  { %1458 = vtanh.f32 %v1868_v22 }
 0x3e6   :  { %v325_v24 = vpop.permute.xlu1 %324 }
 0x3e7   :  { %v1459_v25 = vpop.eup %1458  ;;  %v1872_v26 = vadd.f32 %v325_v24, %v317_v23 }
 0x3e8   :  { %270 = vrot.lane.b32.xlu2 %v1459_v25, %s1705_s2 }
 0x3e9   :  { %1460 = vtanh.f32 %v1872_v26 }
 0x3ef   :  { %v1461_v28 = vpop.eup %1460 }
 0x3f0   :  { %330 = vrot.lane.b32.xlu0 %v1461_v28, %s1705_s2 }
 0x442   :  { %v271_v34 = vpop.permute.xlu2 %270 }
 0x443   :  { %v273_v35 = vmul.f32 %v271_v34, %v254_v10 }
 0x445   :  { %335 = vrot.lane.b32.xlu1 %v273_v35, %s1706_s5 }
 0x462   :  { %v331_v39 = vpop.permute.xlu0 %330 }
 0x463   :  { %v333_v40 = vmul.f32 %v331_v39, %v314_v17 }
 0x465   :  { %360 = vrot.lane.b32.xlu2 %v333_v40, %s1706_s5 }
 0x4b7   :  { %v336_v27 = vpop.permute.xlu1 %335 }
 0x4b8   :  { %1389 = vmatmul.msk.f32.vlgmr.msrb.gmra.mxu0 %vm126_vm4, %v336_v27 }
 0x4b9   :  { %732 = vmatpush.msrb.mxu0 %v1775_v1 }
 0x4bb   :  { %733 = vmatpush.msrb.mxu0 %v1777_v2 }
 0x4bd   :  { %734 = vmatpush.msrb.mxu0 %v1780_v3 }
 0x4bf   :  { %v361_v42 = vpop.permute.xlu2 %360  ;;  %735 = vmatpush.msrb.mxu0 %v1785_v4 }
 0x4c0   :  { %1390 = vmatmul.msk.f32.vlgmr.msrb.gmra.mxu1 %vm126_vm4, %v361_v42  ;;  %1392 = vmatmul.msk.f32.vlgmr.msrb.gmra.mxu2 %vm126_vm4, %v361_v42 }
 0x4c1   :  { %795 = vmatpush.msrb.mxu1 %v1803_v31  ;;  %820 = vmatpush.msrb.mxu2 %v1798_v29 }
 0x4c3   :  { %796 = vmatpush.msrb.mxu1 %v1820_v36  ;;  %821 = vmatpush.msrb.mxu2 %v1800_v30 }
 0x4c5   :  { %797 = vmatpush.msrb.mxu1 %v1822_v37  ;;  %822 = vmatpush.msrb.mxu2 %v1805_v32 }
 0x4c7   :  { %798 = vmatpush.msrb.mxu1 %v1826_v38  ;;  %823 = vmatpush.msrb.mxu2 %v1811_v33 }
 0x535   :  { %v356_v43 = vpop.f32.mrf.mxu0 }
 0x53d   :  { %v381_v44 = vpop.f32.mrf.mxu1 }
 0x53e   :  { %v382_v45 = vadd.f32 %v381_v44, %v356_v43 }
 0x540   :  { %v384_v46 = vadd.f32 %v1861_v41, %v382_v45  ;;  %v571_v45 = vld [vmem:[#allocation3 + $0x18] sm:$0xff] }
 0x542   :  { %1462 = vtanh.f32 %v384_v46  ;;  %v1391_v52 = vmul.f32 -1.442695, %v384_v46 }
 0x543   :  { %v441_v48 = vpop.f32.mrf.mxu2 }
 0x544   :  { %v444_v49 = vadd.f32 %v441_v48, %v423_v47 }
 0x546   :  { %1464 = vtanh.f32 %v444_v49  ;;  %v1393_v53 = vmul.f32 -1.442695, %v444_v49 }
 0x547   :  { %1466 = vpow2.f32 %v1391_v52 }
 0x548   :  { %v1463_v50 = vpop.eup %1462  ;;  %1468 = vpow2.f32 %v1393_v53 }
 0x549   :  { %407 = vrot.lane.b32.xlu0 %v1463_v50, %s1705_s2 }
 0x54c   :  { %v1465_v51 = vpop.eup %1464 }
 0x54d   :  { %467 = vrot.lane.b32.xlu1 %v1465_v51, %s1705_s2  ;;  %v1467_v54 = vpop.eup %1466 }
 0x54e   :  { %v388_v55 = vadd.f32 1.0, %v1467_v54  ;;  %v1469_v56 = vpop.eup %1468 }
 0x54f   :  { %v448_v57 = vadd.f32 1.0, %v1469_v56 }
 0x550   :  { %1470 = vrcp.f32 %v388_v55  ;;  %v400_v7 = vand.u32 2147483648, %v388_v55  ;;  %vm394_vm14 = vweird.f32 %v388_v55  ;;  %v398_v8 = vand.u32 2147483647, %v388_v55 }
 0x551   :  { %1472 = vrcp.f32 %v448_v57  ;;  %v460_v12 = vand.u32 2147483648, %v448_v57  ;;  %vm454_vm2 = vweird.f32 %v448_v57  ;;  %v458_v13 = vand.u32 2147483647, %v448_v57 }
 0x552   :  { %v401_v11 = vor.u32 1.1754944e-38, %v400_v7  ;;  %vm399_vm1 = vcmp.eq.f32.partialorder %v398_v8, 8.507059e+37 }
 0x553   :  { %v461_v18 = vor.u32 1.1754944e-38, %v460_v12  ;;  %vm459_vm5 = vcmp.eq.f32.partialorder %v458_v13, 8.507059e+37 }
 0x556   :  { %v1471_v58 = vpop.eup %1470 }
 0x557   :  { %v390_v59 = vmul.f32 %v1471_v58, %v388_v55  ;;  %v1473_v60 = vpop.eup %1472  ;;  %vm395_vm13 = vweird.f32 %v1471_v58 }
 0x558   :  { %v450_v62 = vmul.f32 %v1473_v60, %v448_v57  ;;  %vm396_vm15 = vmor %vm394_vm14, %vm395_vm13  ;;  %vm455_vm0 = vweird.f32 %v1473_v60 }
 0x559   :  { %v391_v61 = vsub.f32 1.0, %v390_v59  ;;  %vm456_vm3 = vmor %vm454_vm2, %vm455_vm0 }
 0x55a   :  { %v451_v0 = vsub.f32 1.0, %v450_v62 }
 0x55b   :  { %v392_v63 = vmul.f32 %v1471_v58, %v391_v61 }
 0x55c   :  { %v452_v6 = vmul.f32 %v1473_v60, %v451_v0 }
 0x55d   :  { %v393_v5 = vadd.f32 %v1471_v58, %v392_v63 }
 0x55e   :  { %v453_v10 = vadd.f32 %v1473_v60, %v452_v6 }
 0x55f   :  { %v397_v9 = vsel %vm396_vm15, %v1471_v58, %v393_v5 }
 0x560   :  { %v402_v15 = vsel %vm399_vm1, %v401_v11, %v397_v9  ;;  %v457_v17 = vsel %vm456_vm3, %v1473_v60, %v453_v10 }
 0x561   :  { %v462_v20 = vsel %vm459_vm5, %v461_v18, %v457_v17  ;;  %v405_v23 = vmul.f32 %v402_v15, %v1868_v22 }
 0x562   :  { %v465_v34 = vmul.f32 %v462_v20, %v1872_v26 }
 0x5bb   :  { %v408_v14 = vpop.permute.xlu0 %407 }
 0x5bc   :  { %v410_v16 = vmul.f32 %v408_v14, %v402_v15 }
 0x5be   :  { %412 = vrot.lane.b32.xlu2 %v410_v16, %s1706_s5 }
 0x5bf   :  { %v468_v19 = vpop.permute.xlu1 %467 }
 0x5c0   :  { %v470_v21 = vmul.f32 %v468_v19, %v462_v20 }
 0x5c2   :  { %472 = vrot.lane.b32.xlu0 %v470_v21, %s1706_s5 }
 0x618   :  { %v413_v24 = vpop.permute.xlu2 %412 }
 0x619   :  { %v1900_v25 = vadd.f32 %v413_v24, %v405_v23 }
 0x61b   :  { %1474 = vtanh.f32 %v1900_v25 }
 0x621   :  { %v1475_v28 = vpop.eup %1474 }
 0x622   :  { %418 = vrot.lane.b32.xlu1 %v1475_v28, %s1705_s2 }
 0x634   :  { %v473_v35 = vpop.permute.xlu0 %472 }
 0x635   :  { %v1905_v39 = vadd.f32 %v473_v35, %v465_v34 }
 0x637   :  { %1476 = vtanh.f32 %v1905_v39 }
 0x63d   :  { %v1477_v40 = vpop.eup %1476 }
 0x63e   :  { %478 = vrot.lane.b32.xlu2 %v1477_v40, %s1705_s2 }
 0x694   :  { %v419_v27 = vpop.permute.xlu1 %418 }
 0x695   :  { %v421_v22 = vmul.f32 %v419_v27, %v402_v15 }
 0x697   :  { %483 = vrot.lane.b32.xlu0 %v421_v22, %s1706_s5 }
 0x698   :  { %v479_v42 = vpop.permute.xlu2 %478 }
 0x699   :  { %v481_v43 = vmul.f32 %v479_v42, %v462_v20 }
 0x69b   :  { %508 = vrot.lane.b32.xlu1 %v481_v43, %s1706_s5 }
 0x709   :  { %v484_v44 = vpop.permute.xlu0 %483 }
 0x70a   :  { %1394 = vmatmul.msk.f32.vlgmr.msrb.gmra.mxu3 %vm126_vm4, %v484_v44 }
 0x70b   :  { %880 = vmatpush.msrb.mxu3 %v1775_v1 }
 0x70d   :  { %v509_v26 = vpop.permute.xlu1 %508  ;;  %881 = vmatpush.msrb.mxu3 %v1777_v2 }
 0x70e   :  { %1395 = vmatmul.msk.f32.vlgmr.msra.gmra.mxu0 %vm126_vm4, %v509_v26  ;;  %1397 = vmatmul.msk.f32.vlgmr.msra.gmra.mxu1 %vm126_vm4, %v509_v26 }
 0x70f   :  { %882 = vmatpush.msrb.mxu3 %v1780_v3  ;;  %968 = vmatpush.msra.mxu1 %v1798_v29 }
 0x710   :  { %943 = vmatpush.msra.mxu0 %v1803_v31 }
 0x711   :  { %883 = vmatpush.msrb.mxu3 %v1785_v4  ;;  %969 = vmatpush.msra.mxu1 %v1800_v30 }
 0x712   :  { %944 = vmatpush.msra.mxu0 %v1820_v36 }
 0x713   :  { %970 = vmatpush.msra.mxu1 %v1805_v32 }
 0x714   :  { %945 = vmatpush.msra.mxu0 %v1822_v37 }
 0x715   :  { %971 = vmatpush.msra.mxu1 %v1811_v33 }
 0x716   :  { %946 = vmatpush.msra.mxu0 %v1826_v38 }
 0x78b   :  { %v589_v46 = vpop.f32.mrf.mxu1  ;;  %v529_v48 = vpop.f32.mrf.mxu0 }
 0x78c   :  { %v592_v47 = vadd.f32 %v589_v46, %v571_v45 }
 0x78d   :  { %v504_v49 = vpop.f32.mrf.mxu3 }
 0x78e   :  { %1478 = vtanh.f32 %v592_v47  ;;  %v530_v50 = vadd.f32 %v529_v48, %v504_v49  ;;  %v1398_v57 = vmul.f32 -1.442695, %v592_v47  ;;  %v719_v47 = vld [vmem:[#allocation3 + $0x20] sm:$0xff] }
 0x790   :  { %v532_v51 = vadd.f32 %v1861_v41, %v530_v50 }
 0x792   :  { %1480 = vtanh.f32 %v532_v51  ;;  %v1396_v54 = vmul.f32 -1.442695, %v532_v51 }
 0x794   :  { %v1479_v52 = vpop.eup %1478  ;;  %1482 = vpow2.f32 %v1396_v54 }
 0x795   :  { %615 = vrot.lane.b32.xlu0 %v1479_v52, %s1705_s2 }
 0x798   :  { %v1481_v53 = vpop.eup %1480 }
 0x799   :  { %555 = vrot.lane.b32.xlu2 %v1481_v53, %s1705_s2 }
 0x79a   :  { %v1483_v55 = vpop.eup %1482 }
 0x79b   :  { %v536_v56 = vadd.f32 1.0, %v1483_v55 }
 0x79d   :  { %1484 = vrcp.f32 %v536_v56  ;;  %v548_v5 = vand.u32 2147483648, %v536_v56  ;;  %vm542_vm7 = vweird.f32 %v536_v56  ;;  %v546_v6 = vand.u32 2147483647, %v536_v56 }
 0x79e   :  { %1486 = vpow2.f32 %v1398_v57 }
 0x79f   :  { %v549_v9 = vor.u32 1.1754944e-38, %v548_v5  ;;  %vm547_vm9 = vcmp.eq.f32.partialorder %v546_v6, 8.507059e+37 }
 0x7a3   :  { %v1485_v58 = vpop.eup %1484 }
 0x7a4   :  { %v538_v59 = vmul.f32 %v1485_v58, %v536_v56  ;;  %v1487_v60 = vpop.eup %1486  ;;  %vm543_vm6 = vweird.f32 %v1485_v58 }
 0x7a5   :  { %v596_v62 = vadd.f32 1.0, %v1487_v60  ;;  %vm544_vm8 = vmor %vm542_vm7, %vm543_vm6 }
 0x7a6   :  { %v539_v61 = vsub.f32 1.0, %v538_v59 }
 0x7a7   :  { %1488 = vrcp.f32 %v596_v62  ;;  %v608_v17 = vand.u32 2147483648, %v596_v62  ;;  %vm602_vm11 = vweird.f32 %v596_v62  ;;  %v606_v18 = vand.u32 2147483647, %v596_v62 }
 0x7a8   :  { %v540_v63 = vmul.f32 %v1485_v58, %v539_v61 }
 0x7a9   :  { %v609_v20 = vor.u32 1.1754944e-38, %v608_v17  ;;  %vm607_vm13 = vcmp.eq.f32.partialorder %v606_v18, 8.507059e+37 }
 0x7aa   :  { %v541_v0 = vadd.f32 %v1485_v58, %v540_v63 }
 0x7ac   :  { %v545_v7 = vsel %vm544_vm8, %v1485_v58, %v541_v0 }
 0x7ad   :  { %v1489_v8 = vpop.eup %1488  ;;  %v550_v11 = vsel %vm547_vm9, %v549_v9, %v545_v7 }
 0x7ae   :  { %v598_v13 = vmul.f32 %v1489_v8, %v596_v62  ;;  %vm603_vm10 = vweird.f32 %v1489_v8  ;;  %v553_v40 = vmul.f32 %v550_v11, %v1900_v25 }
 0x7af   :  { %vm604_vm12 = vmor %vm602_vm11, %vm603_vm10 }
 0x7b0   :  { %v599_v14 = vsub.f32 1.0, %v598_v13 }
 0x7b2   :  { %v600_v15 = vmul.f32 %v1489_v8, %v599_v14 }
 0x7b4   :  { %v601_v16 = vadd.f32 %v1489_v8, %v600_v15 }
 0x7b6   :  { %v605_v19 = vsel %vm604_vm12, %v1489_v8, %v601_v16 }
 0x7b7   :  { %v610_v23 = vsel %vm607_vm13, %v609_v20, %v605_v19 }
 0x7b8   :  { %v613_v28 = vmul.f32 %v610_v23, %v1905_v39 }
 0x7f3   :  { %v556_v10 = vpop.permute.xlu2 %555 }
 0x7f4   :  { %v558_v12 = vmul.f32 %v556_v10, %v550_v11 }
 0x7f6   :  { %560 = vrot.lane.b32.xlu1 %v558_v12, %s1706_s5 }
 0x807   :  { %v616_v21 = vpop.permute.xlu0 %615 }
 0x808   :  { %v618_v24 = vmul.f32 %v616_v21, %v610_v23 }
 0x80a   :  { %620 = vrot.lane.b32.xlu2 %v618_v24, %s1706_s5 }
 0x864   :  { %v621_v34 = vpop.permute.xlu2 %620 }
 0x865   :  { %v1932_v35 = vadd.f32 %v621_v34, %v613_v28 }
 0x867   :  { %1490 = vtanh.f32 %v1932_v35 }
 0x868   :  { %v561_v27 = vpop.permute.xlu1 %560 }
 0x869   :  { %v1936_v22 = vadd.f32 %v561_v27, %v553_v40 }
 0x86b   :  { %1492 = vtanh.f32 %v1936_v22 }
 0x86d   :  { %v1491_v42 = vpop.eup %1490 }
 0x86e   :  { %626 = vrot.lane.b32.xlu1 %v1491_v42, %s1705_s2 }
 0x871   :  { %v1493_v43 = vpop.eup %1492 }
 0x872   :  { %566 = vrot.lane.b32.xlu0 %v1493_v43, %s1705_s2 }
 0x8e0   :  { %v627_v44 = vpop.permute.xlu1 %626 }
 0x8e1   :  { %v629_v39 = vmul.f32 %v627_v44, %v610_v23 }
 0x8e3   :  { %656 = vrot.lane.b32.xlu0 %v629_v39, %s1706_s5 }
 0x8e4   :  { %v567_v26 = vpop.permute.xlu0 %566 }
 0x8e5   :  { %v569_v45 = vmul.f32 %v567_v26, %v550_v11 }
 0x8e7   :  { %631 = vrot.lane.b32.xlu2 %v569_v45, %s1706_s5 }
 0x941   :  { %v632_v25 = vpop.permute.xlu2 %631 }
 0x942   :  { %1399 = vmatmul.msk.f32.vlgmr.msra.gmra.mxu2 %vm126_vm4, %v632_v25 }
 0x943   :  { %1028 = vmatpush.msra.mxu2 %v1775_v1 }
 0x945   :  { %1029 = vmatpush.msra.mxu2 %v1777_v2 }
 0x947   :  { %1030 = vmatpush.msra.mxu2 %v1780_v3 }
 0x949   :  { %1031 = vmatpush.msra.mxu2 %v1785_v4 }
 0x955   :  { %v657_v46 = vpop.permute.xlu0 %656 }
 0x956   :  { %1400 = vmatmul.msk.f32.vlgmr.msra.gmra.mxu3 %vm126_vm4, %v657_v46  ;;  %1402 = vmatmul.msk.f32.vlgmr.msrb.gmra.mxu0 %vm126_vm4, %v657_v46 }
 0x957   :  { %1091 = vmatpush.msra.mxu3 %v1803_v31  ;;  %1116 = vmatpush.msrb.mxu0 %v1798_v29 }
 0x959   :  { %1092 = vmatpush.msra.mxu3 %v1820_v36  ;;  %1117 = vmatpush.msrb.mxu0 %v1800_v30 }
 0x95b   :  { %1093 = vmatpush.msra.mxu3 %v1822_v37  ;;  %1118 = vmatpush.msrb.mxu0 %v1805_v32 }
 0x95d   :  { %1094 = vmatpush.msra.mxu3 %v1826_v38  ;;  %1119 = vmatpush.msrb.mxu0 %v1811_v33 }
 0x9c5   :  { %v652_v50 = vpop.f32.mrf.mxu2 }
 0x9d3   :  { %v737_v48 = vpop.f32.mrf.mxu0 }
 0x9d4   :  { %v740_v49 = vadd.f32 %v737_v48, %v719_v47 }
 0x9d6   :  { %1494 = vtanh.f32 %v740_v49  ;;  %v1403_v59 = vmul.f32 -1.442695, %v740_v49 }
 0x9d9   :  { %v677_v51 = vpop.f32.mrf.mxu3 }
 0x9da   :  { %v678_v52 = vadd.f32 %v677_v51, %v652_v50 }
 0x9dc   :  { %v1495_v53 = vpop.eup %1494  ;;  %v680_v54 = vadd.f32 %v1861_v41, %v678_v52 }
 0x9dd   :  { %763 = vrot.lane.b32.xlu1 %v1495_v53, %s1705_s2 }
 0x9de   :  { %1496 = vtanh.f32 %v680_v54  ;;  %v1401_v56 = vmul.f32 -1.442695, %v680_v54 }
 0x9e0   :  { %1498 = vpow2.f32 %v1401_v56 }
 0x9e4   :  { %v1497_v55 = vpop.eup %1496 }
 0x9e5   :  { %703 = vrot.lane.b32.xlu2 %v1497_v55, %s1705_s2 }
 0x9e6   :  { %v1499_v57 = vpop.eup %1498 }
 0x9e7   :  { %v684_v58 = vadd.f32 1.0, %v1499_v57 }
 0x9e9   :  { %1500 = vrcp.f32 %v684_v58  ;;  %v696_v8 = vand.u32 2147483648, %v684_v58  ;;  %vm690_vm15 = vweird.f32 %v684_v58  ;;  %v694_v9 = vand.u32 2147483647, %v684_v58 }
 0x9ea   :  { %1502 = vpow2.f32 %v1403_v59 }
 0x9eb   :  { %v697_v12 = vor.u32 1.1754944e-38, %v696_v8  ;;  %vm695_vm1 = vcmp.eq.f32.partialorder %v694_v9, 8.507059e+37 }
 0x9ef   :  { %v1501_v60 = vpop.eup %1500 }
 0x9f0   :  { %v1503_v61 = vpop.eup %1502  ;;  %v686_v62 = vmul.f32 %v1501_v60, %v684_v58  ;;  %vm691_vm14 = vweird.f32 %v1501_v60 }
 0x9f1   :  { %v744_v63 = vadd.f32 1.0, %v1503_v61  ;;  %vm692_vm0 = vmor %vm690_vm15, %vm691_vm14 }
 0x9f2   :  { %v687_v0 = vsub.f32 1.0, %v686_v62 }
 0x9f3   :  { %1504 = vrcp.f32 %v744_v63  ;;  %v756_v19 = vand.u32 2147483648, %v744_v63  ;;  %vm750_vm3 = vweird.f32 %v744_v63  ;;  %v754_v20 = vand.u32 2147483647, %v744_v63 }
 0x9f4   :  { %v688_v5 = vmul.f32 %v1501_v60, %v687_v0 }
 0x9f5   :  { %v757_v23 = vor.u32 1.1754944e-38, %v756_v19  ;;  %vm755_vm6 = vcmp.eq.f32.partialorder %v754_v20, 8.507059e+37 }
 0x9f6   :  { %v689_v6 = vadd.f32 %v1501_v60, %v688_v5 }
 0x9f8   :  { %v693_v10 = vsel %vm692_vm0, %v1501_v60, %v689_v6 }
 0x9f9   :  { %v1505_v7 = vpop.eup %1504  ;;  %v698_v14 = vsel %vm695_vm1, %v697_v12, %v693_v10 }
 0x9fa   :  { %v746_v11 = vmul.f32 %v1505_v7, %v744_v63  ;;  %vm751_vm2 = vweird.f32 %v1505_v7  ;;  %v701_v40 = vmul.f32 %v698_v14, %v1936_v22 }
 0x9fb   :  { %vm752_vm5 = vmor %vm750_vm3, %vm751_vm2 }
 0x9fc   :  { %v747_v16 = vsub.f32 1.0, %v746_v11 }
 0x9fe   :  { %v748_v17 = vmul.f32 %v1505_v7, %v747_v16 }
 0xa00   :  { %v749_v18 = vadd.f32 %v1505_v7, %v748_v17 }
 0xa02   :  { %v753_v21 = vsel %vm752_vm5, %v1505_v7, %v749_v18 }
 0xa03   :  { %v758_v28 = vsel %vm755_vm6, %v757_v23, %v753_v21 }
 0xa04   :  { %v761_v44 = vmul.f32 %v758_v28, %v1932_v35 }
 0xa3f   :  { %v704_v13 = vpop.permute.xlu2 %703 }
 0xa40   :  { %v706_v15 = vmul.f32 %v704_v13, %v698_v14 }
 0xa42   :  { %708 = vrot.lane.b32.xlu1 %v706_v15, %s1706_s5 }
 0xa4f   :  { %v764_v24 = vpop.permute.xlu1 %763 }
 0xa50   :  { %v766_v34 = vmul.f32 %v764_v24, %v758_v28 }
 0xa52   :  { %768 = vrot.lane.b32.xlu0 %v766_v34, %s1706_s5 }
 0xab4   :  { %v709_v27 = vpop.permute.xlu1 %708 }
 0xab5   :  { %v1964_v42 = vadd.f32 %v709_v27, %v701_v40 }
 0xab7   :  { %1506 = vtanh.f32 %v1964_v42 }
 0xabd   :  { %v1507_v43 = vpop.eup %1506 }
 0xabe   :  { %714 = vrot.lane.b32.xlu0 %v1507_v43, %s1705_s2 }
 0xac4   :  { %v769_v39 = vpop.permute.xlu0 %768 }
 0xac5   :  { %v1969_v26 = vadd.f32 %v769_v39, %v761_v44 }
 0xac7   :  { %1508 = vtanh.f32 %v1969_v26 }
 0xacd   :  { %v1509_v45 = vpop.eup %1508 }
 0xace   :  { %774 = vrot.lane.b32.xlu2 %v1509_v45, %s1705_s2  ;;  %v1015_v45 = vld [vmem:[#allocation3 + $0x30] sm:$0xff] }
 0xb28   :  { %v775_v25 = vpop.permute.xlu2 %774 }
 0xb29   :  { %v777_v22 = vmul.f32 %v775_v25, %v758_v28 }
 0xb2b   :  { %804 = vrot.lane.b32.xlu1 %v777_v22, %s1706_s5 }
 0xb30   :  { %v715_v46 = vpop.permute.xlu0 %714 }
 0xb31   :  { %v717_v47 = vmul.f32 %v715_v46, %v698_v14 }
 0xb33   :  { %779 = vrot.lane.b32.xlu2 %v717_v47, %s1706_s5 }
 0xb8d   :  { %v780_v48 = vpop.permute.xlu2 %779 }
 0xb8e   :  { %1404 = vmatmul.msk.f32.vlgmr.msrb.gmra.mxu1 %vm126_vm4, %v780_v48 }
 0xb8f   :  { %1176 = vmatpush.msrb.mxu1 %v1775_v1  ;;  %v867_v1 = vld [vmem:[#allocation3 + $0x28] sm:$0xff] }
 0xb91   :  { %1177 = vmatpush.msrb.mxu1 %v1777_v2 }
 0xb93   :  { %1178 = vmatpush.msrb.mxu1 %v1780_v3 }
 0xb95   :  { %1179 = vmatpush.msrb.mxu1 %v1785_v4 }
 0xb9d   :  { %v805_v35 = vpop.permute.xlu1 %804 }
 0xb9e   :  { %1405 = vmatmul.msk.f32.vlgmr.msrb.gmra.mxu2 %vm126_vm4, %v805_v35  ;;  %1407 = vmatmul.msk.f32.vlgmr.msrb.gmra.mxu3 %vm126_vm4, %v805_v35 }
 0xb9f   :  { %1264 = vmatpush.msrb.mxu3 %v1798_v29  ;;  %1239 = vmatpush.msrb.mxu2 %v1803_v31 }
 0xba1   :  { %1265 = vmatpush.msrb.mxu3 %v1800_v30  ;;  %1240 = vmatpush.msrb.mxu2 %v1820_v36 }
 0xba3   :  { %1266 = vmatpush.msrb.mxu3 %v1805_v32  ;;  %1241 = vmatpush.msrb.mxu2 %v1822_v37 }
 0xba5   :  { %1267 = vmatpush.msrb.mxu3 %v1811_v33  ;;  %1242 = vmatpush.msrb.mxu2 %v1826_v38 }
 0xc0b   :  { %v800_v2 = vpop.f32.mrf.mxu1 }
 0xc21   :  { %v825_v3 = vpop.f32.mrf.mxu2  ;;  %v885_v4 = vpop.f32.mrf.mxu3 }
 0xc22   :  { %v826_v49 = vadd.f32 %v825_v3, %v800_v2  ;;  %v888_v29 = vadd.f32 %v885_v4, %v867_v1 }
 0xc24   :  { %v828_v31 = vadd.f32 %v1861_v41, %v826_v49  ;;  %1510 = vtanh.f32 %v888_v29  ;;  %v1408_v36 = vmul.f32 -1.442695, %v888_v29 }
 0xc26   :  { %1512 = vtanh.f32 %v828_v31  ;;  %v1406_v33 = vmul.f32 -1.442695, %v828_v31 }
 0xc27   :  { %1514 = vpow2.f32 %v1408_v36 }
 0xc28   :  { %1516 = vpow2.f32 %v1406_v33 }
 0xc2a   :  { %v1511_v30 = vpop.eup %1510 }
 0xc2b   :  { %911 = vrot.lane.b32.xlu1 %v1511_v30, %s1705_s2 }
 0xc2c   :  { %v1513_v32 = vpop.eup %1512 }
 0xc2d   :  { %851 = vrot.lane.b32.xlu0 %v1513_v32, %s1705_s2  ;;  %v1515_v37 = vpop.eup %1514 }
 0xc2e   :  { %v1517_v38 = vpop.eup %1516  ;;  %v892_v50 = vadd.f32 1.0, %v1515_v37 }
 0xc2f   :  { %v832_v51 = vadd.f32 1.0, %v1517_v38 }
 0xc30   :  { %1518 = vrcp.f32 %v892_v50  ;;  %v904_v61 = vand.u32 2147483648, %v892_v50  ;;  %vm898_vm8 = vweird.f32 %v892_v50  ;;  %v902_v62 = vand.u32 2147483647, %v892_v50 }
 0xc31   :  { %1520 = vrcp.f32 %v832_v51  ;;  %v844_v0 = vand.u32 2147483648, %v832_v51  ;;  %vm838_vm11 = vweird.f32 %v832_v51  ;;  %v842_v6 = vand.u32 2147483647, %v832_v51 }
 0xc32   :  { %v905_v7 = vor.u32 1.1754944e-38, %v904_v61  ;;  %vm903_vm13 = vcmp.eq.f32.partialorder %v902_v62, 8.507059e+37 }
 0xc33   :  { %v845_v11 = vor.u32 1.1754944e-38, %v844_v0  ;;  %vm843_vm14 = vcmp.eq.f32.partialorder %v842_v6, 8.507059e+37 }
 0xc36   :  { %v1519_v52 = vpop.eup %1518 }
 0xc37   :  { %v1521_v53 = vpop.eup %1520  ;;  %v894_v54 = vmul.f32 %v1519_v52, %v892_v50  ;;  %vm899_vm7 = vweird.f32 %v1519_v52 }
 0xc38   :  { %v834_v55 = vmul.f32 %v1521_v53, %v832_v51  ;;  %vm839_vm9 = vweird.f32 %v1521_v53  ;;  %vm900_vm10 = vmor %vm898_vm8, %vm899_vm7 }
 0xc39   :  { %v895_v56 = vsub.f32 1.0, %v894_v54  ;;  %vm840_vm12 = vmor %vm838_vm11, %vm839_vm9 }
 0xc3a   :  { %v835_v57 = vsub.f32 1.0, %v834_v55 }
 0xc3b   :  { %v896_v58 = vmul.f32 %v1519_v52, %v895_v56 }
 0xc3c   :  { %v836_v59 = vmul.f32 %v1521_v53, %v835_v57 }
 0xc3d   :  { %v897_v60 = vadd.f32 %v1519_v52, %v896_v58 }
 0xc3e   :  { %v837_v63 = vadd.f32 %v1521_v53, %v836_v59 }
 0xc3f   :  { %v901_v5 = vsel %vm900_vm10, %v1519_v52, %v897_v60 }
 0xc40   :  { %v841_v8 = vsel %vm840_vm12, %v1521_v53, %v837_v63  ;;  %v906_v10 = vsel %vm903_vm13, %v905_v7, %v901_v5 }
 0xc41   :  { %v846_v14 = vsel %vm843_vm14, %v845_v11, %v841_v8  ;;  %v909_v20 = vmul.f32 %v906_v10, %v1969_v26 }
 0xc42   :  { %v849_v16 = vmul.f32 %v846_v14, %v1964_v42 }
 0xc9d   :  { %v912_v9 = vpop.permute.xlu1 %911 }
 0xc9e   :  { %v914_v12 = vmul.f32 %v912_v9, %v906_v10 }
 0xc9f   :  { %v852_v13 = vpop.permute.xlu0 %851 }
 0xca0   :  { %v854_v15 = vmul.f32 %v852_v13, %v846_v14  ;;  %916 = vrot.lane.b32.xlu0 %v914_v12, %s1706_s5 }
 0xca2   :  { %856 = vrot.lane.b32.xlu2 %v854_v15, %s1706_s5 }
 0xcfc   :  { %v857_v17 = vpop.permute.xlu2 %856 }
 0xcfd   :  { %v1996_v18 = vadd.f32 %v857_v17, %v849_v16 }
 0xcff   :  { %1522 = vtanh.f32 %v1996_v18 }
 0xd05   :  { %v1523_v19 = vpop.eup %1522 }
 0xd06   :  { %862 = vrot.lane.b32.xlu1 %v1523_v19, %s1705_s2  ;;  %v1163_v19 = vld [vmem:[#allocation3 + $0x38] sm:$0xff] }
 0xd12   :  { %v917_v21 = vpop.permute.xlu0 %916 }
 0xd13   :  { %v2001_v23 = vadd.f32 %v917_v21, %v909_v20 }
 0xd15   :  { %1524 = vtanh.f32 %v2001_v23 }
 0xd1b   :  { %v1525_v24 = vpop.eup %1524 }
 0xd1c   :  { %922 = vrot.lane.b32.xlu2 %v1525_v24, %s1705_s2 }
 0xd76   :  { %v923_v28 = vpop.permute.xlu2 %922 }
 0xd77   :  { %v925_v34 = vmul.f32 %v923_v28, %v906_v10 }
 0xd78   :  { %v863_v40 = vpop.permute.xlu1 %862 }
 0xd79   :  { %v865_v27 = vmul.f32 %v863_v40, %v846_v14  ;;  %952 = vrot.lane.b32.xlu1 %v925_v34, %s1706_s5  ;;  %v2033_v34 = vld [vmem:[%s2068_s4] ss:$0 sm:$0xff] }
 0xd7b   :  { %927 = vrot.lane.b32.xlu0 %v865_v27, %s1706_s5 }
 0xdeb   :  { %v953_v42 = vpop.permute.xlu1 %952 }
 0xdec   :  { %1410 = vmatmul.msk.f32.vlgmr.msra.gmra.mxu1 %vm126_vm4, %v953_v42  ;;  %1412 = vmatmul.msk.f32.vlgmr.msra.gmra.mxu2 %vm126_vm4, %v953_v42 }
 0xded   :  { %v928_v43 = vpop.permute.xlu0 %927 }
 0xdee   :  { %1409 = vmatmul.msk.f32.vlgmr.msra.gmra.mxu0 %vm126_vm4, %v928_v43 }
 0xe69   :  { %v973_v44 = vpop.f32.mrf.mxu1 }
 0xe6b   :  { %v948_v39 = vpop.f32.mrf.mxu0 }
 0xe6c   :  { %v974_v26 = vadd.f32 %v973_v44, %v948_v39 }
 0xe6e   :  { %v976_v25 = vadd.f32 %v1861_v41, %v974_v26 }
 0xe6f   :  { %v1033_v22 = vpop.f32.mrf.mxu2 }
 0xe70   :  { %1526 = vtanh.f32 %v976_v25  ;;  %v1036_v46 = vadd.f32 %v1033_v22, %v1015_v45  ;;  %v1411_v35 = vmul.f32 -1.442695, %v976_v25 }
 0xe72   :  { %1528 = vtanh.f32 %v1036_v46  ;;  %v1413_v49 = vmul.f32 -1.442695, %v1036_v46 }
 0xe73   :  { %1530 = vpow2.f32 %v1411_v35 }
 0xe76   :  { %v1527_v47 = vpop.eup %1526 }
 0xe77   :  { %999 = vrot.lane.b32.xlu2 %v1527_v47, %s1705_s2 }
 0xe78   :  { %v1529_v48 = vpop.eup %1528 }
 0xe79   :  { %1059 = vrot.lane.b32.xlu0 %v1529_v48, %s1705_s2  ;;  %v1531_v1 = vpop.eup %1530 }
 0xe7a   :  { %v980_v2 = vadd.f32 1.0, %v1531_v1 }
 0xe7c   :  { %1532 = vrcp.f32 %v980_v2  ;;  %v992_v32 = vand.u32 2147483648, %v980_v2  ;;  %vm986_vm0 = vweird.f32 %v980_v2  ;;  %v990_v33 = vand.u32 2147483647, %v980_v2 }
 0xe7d   :  { %1534 = vpow2.f32 %v1413_v49 }
 0xe7e   :  { %v993_v38 = vor.u32 1.1754944e-38, %v992_v32  ;;  %vm991_vm2 = vcmp.eq.f32.partialorder %v990_v33, 8.507059e+37 }
 0xe82   :  { %v1533_v3 = vpop.eup %1532 }
 0xe83   :  { %v982_v4 = vmul.f32 %v1533_v3, %v980_v2  ;;  %v1535_v31 = vpop.eup %1534  ;;  %vm987_vm15 = vweird.f32 %v1533_v3 }
 0xe84   :  { %v1040_v36 = vadd.f32 1.0, %v1535_v31  ;;  %vm988_vm1 = vmor %vm986_vm0, %vm987_vm15 }
 0xe85   :  { %v983_v29 = vsub.f32 1.0, %v982_v4 }
 0xe86   :  { %1536 = vrcp.f32 %v1040_v36  ;;  %v1052_v58 = vand.u32 2147483648, %v1040_v36  ;;  %vm1046_vm5 = vweird.f32 %v1040_v36  ;;  %v1050_v59 = vand.u32 2147483647, %v1040_v36 }
 0xe87   :  { %v984_v41 = vmul.f32 %v1533_v3, %v983_v29 }
 0xe88   :  { %v1053_v61 = vor.u32 1.1754944e-38, %v1052_v58  ;;  %vm1051_vm7 = vcmp.eq.f32.partialorder %v1050_v59, 8.507059e+37 }
 0xe89   :  { %v985_v30 = vadd.f32 %v1533_v3, %v984_v41 }
 0xe8b   :  { %v989_v37 = vsel %vm988_vm1, %v1533_v3, %v985_v30 }
 0xe8c   :  { %v994_v51 = vsel %vm991_vm2, %v993_v38, %v989_v37  ;;  %v1537_v53 = vpop.eup %1536 }
 0xe8d   :  { %v1042_v54 = vmul.f32 %v1537_v53, %v1040_v36  ;;  %vm1047_vm3 = vweird.f32 %v1537_v53  ;;  %v997_v5 = vmul.f32 %v994_v51, %v1996_v18 }
 0xe8e   :  { %vm1048_vm6 = vmor %vm1046_vm5, %vm1047_vm3 }
 0xe8f   :  { %v1043_v55 = vsub.f32 1.0, %v1042_v54 }
 0xe91   :  { %v1044_v56 = vmul.f32 %v1537_v53, %v1043_v55 }
 0xe93   :  { %v1045_v57 = vadd.f32 %v1537_v53, %v1044_v56 }
 0xe95   :  { %v1049_v60 = vsel %vm1048_vm6, %v1537_v53, %v1045_v57 }
 0xe96   :  { %v1054_v63 = vsel %vm1051_vm7, %v1053_v61, %v1049_v60  ;;  %vm1375_vm7 = vcmask 7168  }
 0xe97   :  { %v1057_v8 = vmul.f32 %v1054_v63, %v2001_v23 }
 0xed1   :  { %v1000_v50 = vpop.permute.xlu2 %999 }
 0xed2   :  { %v1002_v52 = vmul.f32 %v1000_v50, %v994_v51 }
 0xed4   :  { %1004 = vrot.lane.b32.xlu1 %v1002_v52, %s1706_s5 }
 0xeeb   :  { %v1060_v62 = vpop.permute.xlu0 %1059 }
 0xeec   :  { %v1062_v0 = vmul.f32 %v1060_v62, %v1054_v63 }
 0xeee   :  { %1064 = vrot.lane.b32.xlu2 %v1062_v0, %s1706_s5 }
 0xf46   :  { %v1005_v6 = vpop.permute.xlu1 %1004 }
 0xf47   :  { %v2016_v7 = vadd.f32 %v1005_v6, %v997_v5 }
 0xf48   :  { %v1065_v9 = vpop.permute.xlu2 %1064 }
 0xf49   :  { %1538 = vtanh.f32 %v2016_v7  ;;  %v2020_v10 = vadd.f32 %v1065_v9, %v1057_v8 }
 0xf4b   :  { %1540 = vtanh.f32 %v2020_v10 }
 0xf4f   :  { %v1539_v11 = vpop.eup %1538 }
 0xf50   :  { %1010 = vrot.lane.b32.xlu0 %v1539_v11, %s1705_s2 }
 0xf51   :  { %v1541_v12 = vpop.eup %1540 }
 0xf52   :  { %1070 = vrot.lane.b32.xlu1 %v1541_v12, %s1705_s2 }
 0xfc2   :  { %v1011_v13 = vpop.permute.xlu0 %1010 }
 0xfc3   :  { %v1013_v14 = vmul.f32 %v1011_v13, %v994_v51 }
 0xfc4   :  { %v1071_v15 = vpop.permute.xlu1 %1070 }
 0xfc5   :  { %1075 = vrot.lane.b32.xlu2 %v1013_v14, %s1706_s5  ;;  %v1073_v16 = vmul.f32 %v1071_v15, %v1054_v63 }
 0xfc7   :  { %1100 = vrot.lane.b32.xlu0 %v1073_v16, %s1706_s5 }
0x101f   :  { %v1076_v17 = vpop.permute.xlu2 %1075 }
0x1020   :  { %1414 = vmatmul.msk.f32.vlgmr.msra.gmra.mxu3 %vm126_vm4, %v1076_v17 }
0x1039   :  { %v1101_v18 = vpop.permute.xlu0 %1100 }
0x103a   :  { %1415 = vmatmul.msk.f32.vlgmr.msrb.gmra.mxu0 %vm126_vm4, %v1101_v18  ;;  %1417 = vmatmul.msk.f32.vlgmr.msrb.gmra.mxu1 %vm126_vm4, %v1101_v18 }
0x10a3   :  { %v1096_v20 = vpop.f32.mrf.mxu3 }
0x10b7   :  { %v1121_v21 = vpop.f32.mrf.mxu0  ;;  %v1181_v23 = vpop.f32.mrf.mxu1 }
0x10b8   :  { %v1122_v24 = vadd.f32 %v1121_v21, %v1096_v20  ;;  %v1184_v28 = vadd.f32 %v1181_v23, %v1163_v19 }
0x10ba   :  { %v1124_v40 = vadd.f32 %v2033_v34, %v1122_v24  ;;  %1542 = vtanh.f32 %v1184_v28  ;;  %v1418_v43 = vmul.f32 -1.442695, %v1184_v28 }
0x10bc   :  { %1544 = vtanh.f32 %v1124_v40  ;;  %v1416_v45 = vmul.f32 -1.442695, %v1124_v40 }
0x10bd   :  { %1546 = vpow2.f32 %v1418_v43 }
0x10c0   :  { %v1543_v27 = vpop.eup %1542 }
0x10c1   :  { %1207 = vrot.lane.b32.xlu2 %v1543_v27, %s1705_s2 }
0x10c2   :  { %v1545_v42 = vpop.eup %1544 }
0x10c3   :  { %1147 = vrot.lane.b32.xlu1 %v1545_v42, %s1705_s2  ;;  %v1547_v44 = vpop.eup %1546 }
0x10c4   :  { %v1188_v39 = vadd.f32 1.0, %v1547_v44 }
0x10c6   :  { %1548 = vrcp.f32 %v1188_v39  ;;  %v1200_v1 = vand.u32 2147483648, %v1188_v39  ;;  %vm1194_vm9 = vweird.f32 %v1188_v39  ;;  %v1198_v2 = vand.u32 2147483647, %v1188_v39 }
0x10c7   :  { %1550 = vpow2.f32 %v1416_v45  ;;  %v1313_v45 = vld [vmem:[#allocation10 + $0x18] sm:$0xff] }
0x10c8   :  { %v1201_v4 = vor.u32 1.1754944e-38, %v1200_v1  ;;  %vm1199_vm11 = vcmp.eq.f32.partialorder %v1198_v2, 8.507059e+37  ;;  %1335 = vmatpush.msra.mxu0 %v1313_v45  ;;  %v1435_v1 = vld [vmem:[%s2070_s6] ss:$0 sm:$0xff] }
0x10c9   :  { %v1436_v2 = vld [vmem:[%s2071_s7] ss:$0 sm:$0xff] }
0x10cc   :  { %v1549_v26 = vpop.eup %1548 }
0x10cd   :  { %v1190_v25 = vmul.f32 %v1549_v26, %v1188_v39  ;;  %v1551_v47 = vpop.eup %1550  ;;  %vm1195_vm8 = vweird.f32 %v1549_v26 }
0x10ce   :  { %v1128_v35 = vadd.f32 1.0, %v1551_v47  ;;  %vm1196_vm10 = vmor %vm1194_vm9, %vm1195_vm8 }
0x10cf   :  { %v1191_v22 = vsub.f32 1.0, %v1190_v25  ;;  %v1312_v25 = vld [vmem:[#allocation10 + $0x10] sm:$0xff] }
0x10d0   :  { %1552 = vrcp.f32 %v1128_v35  ;;  %v1140_v37 = vand.u32 2147483648, %v1128_v35  ;;  %vm1134_vm13 = vweird.f32 %v1128_v35  ;;  %v1138_v38 = vand.u32 2147483647, %v1128_v35  ;;  %1336 = vmatpush.msra.mxu0 %v1312_v25 }
0x10d1   :  { %v1192_v46 = vmul.f32 %v1549_v26, %v1191_v22  ;;  %v1311_v22 = vld [vmem:[#allocation10 + $0x8] sm:$0xff] }
0x10d2   :  { %v1141_v51 = vor.u32 1.1754944e-38, %v1140_v37  ;;  %vm1139_vm15 = vcmp.eq.f32.partialorder %v1138_v38, 8.507059e+37  ;;  %1337 = vmatpush.msra.mxu0 %v1311_v22 }
0x10d3   :  { %v1193_v48 = vadd.f32 %v1549_v26, %v1192_v46  ;;  %v1310_v46 = vld [vmem:[#allocation10] sm:$0xff] }
0x10d4   :  { %1338 = vmatpush.msra.mxu0 %v1310_v46 }
0x10d5   :  { %v1197_v3 = vsel %vm1196_vm10, %v1549_v26, %v1193_v48 }
0x10d6   :  { %v1202_v29 = vsel %vm1199_vm11, %v1201_v4, %v1197_v3  ;;  %v1553_v31 = vpop.eup %1552 }
0x10d7   :  { %v1130_v30 = vmul.f32 %v1553_v31, %v1128_v35  ;;  %vm1135_vm12 = vweird.f32 %v1553_v31  ;;  %v1205_v55 = vmul.f32 %v1202_v29, %v2020_v10 }
0x10d8   :  { %vm1136_vm14 = vmor %vm1134_vm13, %vm1135_vm12 }
0x10d9   :  { %v1131_v32 = vsub.f32 1.0, %v1130_v30 }
0x10db   :  { %v1132_v36 = vmul.f32 %v1553_v31, %v1131_v32 }
0x10dd   :  { %v1133_v33 = vadd.f32 %v1553_v31, %v1132_v36 }
0x10df   :  { %v1137_v50 = vsel %vm1136_vm14, %v1553_v31, %v1133_v33 }
0x10e0   :  { %v1142_v53 = vsel %vm1139_vm15, %v1141_v51, %v1137_v50 }
0x10e1   :  { %v1145_v59 = vmul.f32 %v1142_v53, %v2016_v7 }
0x111b   :  { %v1208_v49 = vpop.permute.xlu2 %1207 }
0x111c   :  { %v1210_v41 = vmul.f32 %v1208_v49, %v1202_v29 }
0x111e   :  { %1212 = vrot.lane.b32.xlu1 %v1210_v41, %s1706_s5  ;;  %v1437_v41 = vld [vmem:[#allocation2] ss:$0 sm:$0xff] }
0x1135   :  { %v1148_v52 = vpop.permute.xlu1 %1147 }
0x1136   :  { %v1150_v54 = vmul.f32 %v1148_v52, %v1142_v53 }
0x1138   :  { %1152 = vrot.lane.b32.xlu0 %v1150_v54, %s1706_s5 }
0x1190   :  { %v1213_v56 = vpop.permute.xlu1 %1212 }
0x1191   :  { %v1215_v57 = vadd.f32 %v1213_v56, %v1205_v55 }
0x1193   :  { %1554 = vtanh.f32 %v1215_v57 }
0x1199   :  { %v1555_v58 = vpop.eup %1554 }
0x119a   :  { %1218 = vrot.lane.b32.xlu0 %v1555_v58, %s1705_s2 }
0x11aa   :  { %v1153_v60 = vpop.permute.xlu0 %1152 }
0x11ab   :  { %v1155_v61 = vadd.f32 %v1153_v60, %v1145_v59 }
0x11ad   :  { %1556 = vtanh.f32 %v1155_v61 }
0x11b3   :  { %v1557_v62 = vpop.eup %1556 }
0x11b4   :  { %1158 = vrot.lane.b32.xlu2 %v1557_v62, %s1705_s2 }
0x120c   :  { %v1219_v63 = vpop.permute.xlu0 %1218 }
0x120d   :  { %v1221_v0 = vmul.f32 %v1219_v63, %v1202_v29 }
0x120e   :  { %v1159_v5 = vpop.permute.xlu2 %1158 }
0x120f   :  { %v1161_v6 = vmul.f32 %v1159_v5, %v1142_v53  ;;  %1248 = vrot.lane.b32.xlu2 %v1221_v0, %s1706_s5 }
0x1211   :  { %1223 = vrot.lane.b32.xlu1 %v1161_v6, %s1706_s5 }
0x1269   :  { %v1249_v8 = vpop.permute.xlu2 %1248 }
0x126a   :  { %1420 = vmatmul.msk.f32.vlgmr.msrb.gmra.mxu3 %vm126_vm4, %v1249_v8 }
0x1283   :  { %v1224_v9 = vpop.permute.xlu1 %1223 }
0x1284   :  { %1419 = vmatmul.msk.f32.vlgmr.msrb.gmra.mxu2 %vm126_vm4, %v1224_v9 }
0x12ed   :  { %v1269_v7 = vpop.f32.mrf.mxu3 }
0x1307   :  { %v1244_v10 = vpop.f32.mrf.mxu2 }
0x1308   :  { %v1270_v11 = vadd.f32 %v1269_v7, %v1244_v10 }
0x130a   :  { %v1272_v12 = vadd.f32 %v2033_v34, %v1270_v11 }
0x130c   :  { %1558 = vtanh.f32 %v1272_v12  ;;  %v1421_v14 = vmul.f32 -1.442695, %v1272_v12 }
0x130e   :  { %1560 = vpow2.f32 %v1421_v14 }
0x1312   :  { %v1559_v13 = vpop.eup %1558 }
0x1313   :  { %1295 = vrot.lane.b32.xlu0 %v1559_v13, %s1705_s2 }
0x1314   :  { %v1561_v15 = vpop.eup %1560 }
0x1315   :  { %v1276_v16 = vadd.f32 1.0, %v1561_v15 }
0x1317   :  { %1562 = vrcp.f32 %v1276_v16  ;;  %v1288_v23 = vand.u32 2147483648, %v1276_v16  ;;  %vm1282_vm1 = vweird.f32 %v1276_v16  ;;  %v1286_v24 = vand.u32 2147483647, %v1276_v16 }
0x1319   :  { %v1289_v34 = vor.u32 1.1754944e-38, %v1288_v23  ;;  %vm1287_vm3 = vcmp.eq.f32.partialorder %v1286_v24, 8.507059e+37 }
0x131d   :  { %v1563_v17 = vpop.eup %1562 }
0x131e   :  { %v1278_v18 = vmul.f32 %v1563_v17, %v1276_v16  ;;  %vm1283_vm0 = vweird.f32 %v1563_v17 }
0x131f   :  { %vm1284_vm2 = vmor %vm1282_vm1, %vm1283_vm0 }
0x1320   :  { %v1279_v19 = vsub.f32 1.0, %v1278_v18 }
0x1322   :  { %v1280_v20 = vmul.f32 %v1563_v17, %v1279_v19 }
0x1324   :  { %v1281_v21 = vadd.f32 %v1563_v17, %v1280_v20 }
0x1326   :  { %v1285_v28 = vsel %vm1284_vm2, %v1563_v17, %v1281_v21 }
0x1327   :  { %v1290_v27 = vsel %vm1287_vm3, %v1289_v34, %v1285_v28 }
0x1328   :  { %v1293_v43 = vmul.f32 %v1290_v27, %v1155_v61 }
0x1385   :  { %v1296_v40 = vpop.permute.xlu0 %1295 }
0x1386   :  { %v1298_v42 = vmul.f32 %v1296_v40, %v1290_v27 }
0x1388   :  { %1300 = vrot.lane.b32.xlu1 %v1298_v42, %s1706_s5 }
0x13fa   :  { %v1301_v44 = vpop.permute.xlu1 %1300 }
0x13fb   :  { %v1303_v39 = vadd.f32 %v1301_v44, %v1293_v43 }
0x13fd   :  { %1564 = vtanh.f32 %v1303_v39 }
0x1403   :  { %v1565_v26 = vpop.eup %1564 }
0x1404   :  { %1306 = vrot.lane.b32.xlu2 %v1565_v26, %s1705_s2 }
0x145e   :  { %v1307_v47 = vpop.permute.xlu2 %1306 }
0x145f   :  { %v1309_v48 = vmul.f32 %v1307_v47, %v1290_v27 }
0x1461   :  { %1319 = vrot.lane.b32.xlu0 %v1309_v48, %s1706_s5 }
0x14d3   :  { %v1320_v35 = vpop.permute.xlu0 %1319 }
0x14d4   :  { %1422 = vmatmul.msk.f32.vlgmr.msra.gmra.mxu0 %vm126_vm4, %v1320_v35 }
0x1551   :  { %v1340_v3 = vpop.f32.mrf.mxu0 }
0x1552   :  { %v1341_v4 = vadd.f32 %v1435_v1, %v1340_v3 }
0x1554   :  { %v1347_v49 = vmul.f32 %v1436_v2, %v1341_v4 }
0x1556   :  { %v1348_v29 = vsel %vm126_vm4, %v1347_v49, 0.0 }
0x1557   :  { %1349 = vadd.xlane.f32.xlu1 %v1348_v29 }
0x15ca   :  { %v1350_v31 = vpop.xlane.xlu1 %1349 }
0x15cb   :  { %v1355_v30 = vadd.f32 %v1437_v41, %v1350_v31 }
0x15cd   :  { %v1423_v32 = vmul.f32 -1.442695, %v1355_v30 }
0x15cf   :  { %1566 = vpow2.f32 %v1423_v32 }
0x15d5   :  { %v1567_v36 = vpop.eup %1566 }
0x15d6   :  { %v1359_v33 = vadd.f32 1.0, %v1567_v36 }
0x15d8   :  { %1568 = vrcp.f32 %v1359_v33  ;;  %v1371_v51 = vand.u32 2147483648, %v1359_v33  ;;  %v1369_v53 = vand.u32 2147483647, %v1359_v33  ;;  %vm1365_vm6 = vweird.f32 %v1359_v33 }
0x15da   :  { %v1372_v55 = vor.u32 1.1754944e-38, %v1371_v51  ;;  %vm1370_vm8 = vcmp.eq.f32.partialorder %v1369_v53, 8.507059e+37 }
0x15de   :  { %v1569_v37 = vpop.eup %1568 }
0x15df   :  { %v1361_v38 = vmul.f32 %v1569_v37, %v1359_v33  ;;  %vm1366_vm5 = vweird.f32 %v1569_v37 }
0x15e0   :  { %vm1367_vm4 = vmor %vm1365_vm6, %vm1366_vm5 }
0x15e1   :  { %v1362_v50 = vsub.f32 1.0, %v1361_v38 }
0x15e3   :  { %v1363_v52 = vmul.f32 %v1569_v37, %v1362_v50 }
0x15e5   :  { %v1364_v54 = vadd.f32 %v1569_v37, %v1363_v52 }
0x15e7   :  { %v1368_v56 = vsel %vm1367_vm4, %v1569_v37, %v1364_v54 }
0x15e8   :  { %v1373_v57 = vsel %vm1370_vm8, %v1372_v55, %v1368_v56 }
0x15e9   :  { %1376 = vst.msk [vmem:[%s2073_s9] sm:$0xff] %vm1375_vm7, %v1373_v57 }
0x15ea   :  { %1381 = vsyncpa [#allocation4], 1 }
0x15eb   :  { %1382 = vsyncpa [#allocation6], 1 }
0x15ec   :  { %1383 = vsyncpa [#allocation9], 1 }

</bundles_post_ra>
